<compile_context>
chip_gen: v7x
topology: tpu7x:2x2x1
jax: 0.10.0
libtpu: 0.0.40
codegen_flags: <defaults>
</compile_context>

<pallas_src>
import jax
import jax.numpy as jnp
from jax.experimental import pallas as pl
from jax.experimental.pallas import tpu as pltpu


def _round_up(x, m):
    return (x + m - 1) // m * m


def _make_kernel(heads, head_dim, embed, n_ff_chunks, use_blockdiag, padded):
    E = embed                      # real (unpadded) embed size
    inv_e = 1.0 / float(E)

    def kernel(k_ref, q_ref, v_ref,
               wq_ref, wk_ref, wv_ref, wfc_ref,
               w1_ref, w2_ref, vecs_ref,
               o_ref):
        NB, S, EP = q_ref.shape
        HP = w1_ref.shape[1]
        R = NB * S
        f32, bf16 = jnp.float32, jnp.bfloat16

        q_in = q_ref[...].reshape(R, EP)
        k_in = k_ref[...].reshape(R, EP)
        v_in = v_ref[...].reshape(R, EP)

        def split_heads(x3):   # (NB, S, E) -> (heads*NB, S, hd), head-major on axis 0
            return jnp.concatenate(
                [x3[:, :, h * head_dim:(h + 1) * head_dim] for h in range(heads)],
                axis=0)

        # ---- QKV projection (softmax 1/sqrt(E) folded into the Q weight) --------
        if use_blockdiag:
            # fused block-diagonal (EP, E) weights: one (R,EP)@(EP,E) matmul each
            qp = jnp.dot(q_in.astype(bf16), wq_ref[...], preferred_element_type=f32)
            kp = jnp.dot(k_in.astype(bf16), wk_ref[...], preferred_element_type=f32)
            vp = jnp.dot(v_in.astype(bf16), wv_ref[...], preferred_element_type=f32)
            qh = split_heads(qp.reshape(NB, S, E))
            kh = split_heads(kp.reshape(NB, S, E))
            vh = split_heads(vp.reshape(NB, S, E))
        else:
            # large-E fallback: heads-batched (hd, hd) projection (no kron blow-up)
            dn_proj = (((2,), (0,)), ((), ()))
            def proj(x2, w_ref):
                xh = split_heads(x2[:, :E].reshape(NB, S, E)).astype(bf16)
                return jax.lax.dot_general(xh, w_ref[...], dn_proj,
                                           preferred_element_type=f32)
            qh, kh, vh = proj(q_in, wq_ref), proj(k_in, wk_ref), proj(v_in, wv_ref)

        # ---- ONE batched scores matmul / softmax / attn@V for ALL heads ---------
        # TODO(synk): for long S, stream kv blocks with online softmax (flash-style)
        # instead of materializing the full (heads*NB, S, S) score tensor.
        dn_scores = (((2,), (2,)), ((0,), (0,)))    # bqd,bkd->bqk
        dn_attv = (((2,), (1,)), ((0,), (0,)))      # bqk,bkd->bqd
        s = jax.lax.dot_general(qh.astype(bf16), kh.astype(bf16), dn_scores,
                                preferred_element_type=f32)        # (H*NB, S, S)
        # NOTE: mask intentionally not applied (reference masked_fill is a no-op).
        m = jnp.max(s, axis=-1, keepdims=True)
        p = jnp.exp(s - m)
        p = p * pl.reciprocal(jnp.sum(p, axis=-1, keepdims=True), approx=True)
        ho = jax.lax.dot_general(p.astype(bf16), vh.astype(bf16), dn_attv,
                                 preferred_element_type=f32)       # (H*NB, S, hd)

        # concat heads back on the lane axis -> ONE (R, E) @ (E, EP) fc matmul
        ho_cat = jnp.concatenate([ho[h * NB:(h + 1) * NB] for h in range(heads)],
                                 axis=-1)                          # (NB, S, E)
        att = jnp.dot(ho_cat.reshape(R, E).astype(bf16), wfc_ref[...],
                      preferred_element_type=f32)                  # (R, EP)

        # ---- packed small parameter vectors --------------------------------------
        g1, be1 = vecs_ref[0:1, :EP], vecs_ref[1:2, :EP]
        g2, be2 = vecs_ref[2:3, :EP], vecs_ref[3:4, :EP]
        b2, b1 = vecs_ref[4:5, :EP], vecs_ref[5:6, :HP]
        lane_mask = vecs_ref[6:7, :EP]

        def layer_norm(x, g, b):
            mu = jnp.sum(x, axis=-1, keepdims=True) * inv_e
            xc = x - mu
            if padded:                      # zero padded lanes before the variance
                xc = xc * lane_mask
            var = jnp.sum(xc * xc, axis=-1, keepdims=True) * inv_e
            return xc * jax.lax.rsqrt(var + 1e-5) * g + b

        # ---- residual + norm1 + row-chunked MLP + residual + norm2 ---------------
        # TODO(synk): dropout omitted (identity in eval/inference mode).
        x = layer_norm(q_in + att, g1, be1)                        # (R, EP) f32
        x_bf = x.astype(bf16)
        chunk = R // n_ff_chunks
        ff_parts = []
        for c in range(n_ff_chunks):        # static chunk count bounds (chunk, HP) live range
            h1 = jnp.dot(x_bf[c * chunk:(c + 1) * chunk, :], w1_ref[...],
                         preferred_element_type=f32) + b1
            h1 = jnp.maximum(h1, 0.0)
            ff_parts.append(jnp.dot(h1.astype(bf16), w2_ref[...],
                                    preferred_element_type=f32))
        ff = (ff_parts[0] if n_ff_chunks == 1
              else jnp.concatenate(ff_parts, axis=0)) + b2
        out = layer_norm(ff + x, g2, be2)
        o_ref[...] = out.reshape(NB, S, EP).astype(o_ref.dtype)

    return kernel


def _device_kind():
    try:
        return jax.devices()[0].device_kind.lower()
    except Exception:
        return ""


def _vmem_limit_bytes(kind):
    if "v7" in kind:
        return 48 << 20            # v7x: 64 MiB physical VMEM per TensorCore
    for tag in ("v4", "v5", "v6"):
        if tag in kind:
            return 96 << 20        # 128 MiB physical VMEM
    return None                     # unknown / older chip: keep the default scoped limit


def _pick_batch_block(N, S, EP, heads, fixed_bytes, budget_bytes, is_v7):
    # rough per-batch-element working set: double-buffered seq blocks + f32 intermediates
    per_b = (4 * 2 * S * EP * 4          # k, q, v, out blocks (double buffered)
             + 10 * S * EP * 4           # projections, att, x, ff intermediates
             + 2 * heads * S * S * 4)    # attention scores + probabilities
    cap = max(1, (budget_bytes - fixed_bytes) // max(per_b, 1))
    cap = min(int(cap), N)
    if is_v7 and N >= 2:
        cap = min(cap, N // 2)           # keep >= 2 grid steps so both TensorCores work
    for d in range(max(cap, 1), 0, -1):  # largest divisor of N <= cap (no NB=1 cliff)
        if N % d == 0:
            return d
    return 1


def _pick_ff_chunks(R, HP, budget_bytes=4 << 20):
    for n in range(1, R + 1):
        if R % n == 0 and (R // n) * HP * 4 <= budget_bytes:
            return n
    return R


def transformer_block(key, query, value, mask, params, heads):
    # The PyTorch reference's masked_fill result is discarded -> mask is a no-op.
    del mask
    N, S, E = query.shape
    hd = E // heads
    hidden = params["w1"].shape[0]
    f32, bf16 = jnp.float32, jnp.bfloat16

    EP = _round_up(E, 128)               # lane-dense embed / output store
    HP = _round_up(hidden, 128)
    scale = 1.0 / (float(E) ** 0.5)

    # kron block-diagonal fused QKV only while E fits the native MXU tile; above
    # that it wastes heads x MXU FLOPs / weight bytes -> per-head fallback.
    use_blockdiag = E <= 256

    if use_blockdiag:
        eye = jnp.eye(heads, dtype=f32)

        def bd(w, s=1.0):
            full = jnp.kron(eye, w.T.astype(f32)) * s                        # (E, E)
            return jnp.zeros((EP, E), f32).at[:E, :].set(full).astype(bf16)  # pad rows

        wq_p, wk_p, wv_p = bd(params["wq"], scale), bd(params["wk"]), bd(params["wv"])
    else:
        wq_p = (params["wq"].T.astype(f32) * scale).astype(bf16)             # (hd, hd)
        wk_p = params["wk"].T.astype(bf16)
        wv_p = params["wv"].T.astype(bf16)

    def pad2(w, rows, cols):
        out = jnp.zeros((rows, cols), f32)
        return out.at[:w.shape[0], :w.shape[1]].set(w.astype(f32)).astype(bf16)

    wfc_p = pad2(params["wfc"].T, E, EP)       # (E, EP)
    w1_p = pad2(params["w1"].T, EP, HP)        # (EP, HP)
    w2_p = pad2(params["w2"].T, HP, EP)        # (HP, EP)

    # Pack the small per-feature vectors + LN lane mask into one (8, W) f32 slab.
    W = max(EP, HP)

    def row(vec):
        return jnp.zeros((1, W), f32).at[0, :vec.shape[0]].set(vec.astype(f32))

    lane_mask = (jnp.arange(W) < E).astype(f32).reshape(1, W)
    vecs = jnp.concatenate(
        [row(params["g1"]), row(params["be1"]),
         row(params["g2"]), row(params["be2"]),
         row(params["b2"]), row(params["b1"]),
         lane_mask, jnp.zeros((1, W), f32)], axis=0)               # (8, W)

    def pad_seq(x):
        x = x.astype(f32)
        return x if EP == E else jnp.pad(x, ((0, 0), (0, 0), (0, EP - E)))

    key_p, query_p, value_p = pad_seq(key), pad_seq(query), pad_seq(value)

    kind = _device_kind()
    is_v7 = "v7" in kind
    vmem_limit = _vmem_limit_bytes(kind)
    budget = (vmem_limit if vmem_limit is not None else 16 << 20) // 2
    weight_bytes = sum(int(w.size) * w.dtype.itemsize
                       for w in (wq_p, wk_p, wv_p, wfc_p, w1_p, w2_p)) + int(vecs.size) * 4
    fixed_bytes = 2 * weight_bytes + (4 << 20)        # weights (worst case 2x) + MLP chunk
    NB = _pick_batch_block(N, S, EP, heads, fixed_bytes, budget, is_v7)
    grid = (N // NB,)
    n_ff_chunks = _pick_ff_chunks(NB * S, HP)

    kernel = _make_kernel(heads, hd, E, n_ff_chunks, use_blockdiag, EP != E)
    weights = (wq_p, wk_p, wv_p, wfc_p, w1_p, w2_p, vecs)
    seq_spec = pl.BlockSpec((NB, S, EP), lambda n: (n, 0, 0))

    cparams = dict(dimension_semantics=("parallel",))
    if vmem_limit is not None:
        cparams["vmem_limit_bytes"] = int(vmem_limit)

    def run(single_buffer_weights):
        def wspec(a):
            nd = a.ndim
            imap = lambda n, _nd=nd: (0,) * _nd
            if single_buffer_weights:
                # constant index_map -> never re-fetched; single-buffer halves weight VMEM
                return pl.BlockSpec(a.shape, imap, pipeline_mode=pl.Buffered(1))
            return pl.BlockSpec(a.shape, imap)

        return pl.pallas_call(
            kernel,
            out_shape=jax.ShapeDtypeStruct((N, S, EP), query.dtype),
            grid=grid,
            in_specs=[seq_spec, seq_spec, seq_spec] + [wspec(w) for w in weights],
            out_specs=seq_spec,
            compiler_params=pltpu.CompilerParams(**cparams),
        )(key_p, query_p, value_p, *weights)

    try:
        out = run(True)
    except Exception:
        # TODO(synk): pl.Buffered(1) single-buffering not supported on this jax
        # version; fall back to default double-buffered constant weights.
        out = run(False)

    return out if EP == E else out[..., :E]


def reference_transformer_block(key, query, value, params, heads):
    """Pure-JAX reference mirroring the PyTorch module (eval mode)."""
    N, S, E = query.shape
    hd = E // heads

    def lin(x, w):  # torch Linear: x @ W.T
        return jnp.matmul(x, w.T)

    v4 = lin(value.reshape(N, S, heads, hd), params["wv"])
    k4 = lin(key.reshape(N, S, heads, hd), params["wk"])
    q4 = lin(query.reshape(N, S, heads, hd), params["wq"])
    w_ = jnp.einsum("nqhd,nkhd->nhqk", q4, k4)
    att = jax.nn.softmax(w_ / (E ** 0.5), axis=3)
    out = jnp.einsum("nhqk,nkhd->nqhd", att, v4).reshape(N, S, E)
    att_out = lin(out, params["wfc"])

    def ln(x, g, b):
        mu = x.mean(-1, keepdims=True)
        var = ((x - mu) ** 2).mean(-1, keepdims=True)
        return (x - mu) / jnp.sqrt(var + 1e-5) * g + b

    x = ln(query + att_out, params["g1"], params["be1"])
    ff = lin(jax.nn.relu(lin(x, params["w1"]) + params["b1"]), params["w2"]) + params["b2"]
    return ln(ff + x, params["g2"], params["be2"])


if __name__ == "__main__":
    N, S, E, heads, forward_expansion = 2, 8, 32, 4, 4
    hd = E // heads
    hidden = forward_expansion * E

    root = jax.random.PRNGKey(0)
    ks = jax.random.split(root, 16)

    def init(k, shape, scale=0.1):
        return scale * jax.random.normal(k, shape, dtype=jnp.float32)

    key_in = init(ks[0], (N, S, E), 1.0)
    query = init(ks[1], (N, S, E), 1.0)
    value = init(ks[2], (N, S, E), 1.0)
    params = dict(
        wq=init(ks[3], (hd, hd)),
        wk=init(ks[4], (hd, hd)),
        wv=init(ks[5], (hd, hd)),
        wfc=init(ks[6], (E, E)),
        g1=1.0 + init(ks[7], (E,)),
        be1=init(ks[8], (E,)),
        g2=1.0 + init(ks[9], (E,)),
        be2=init(ks[10], (E,)),
        w1=init(ks[11], (hidden, E)),
        b1=init(ks[12], (hidden,)),
        w2=init(ks[13], (E, hidden)),
        b2=init(ks[14], (E,)),
    )
    mask = jnp.ones((N, 1, S, S), dtype=jnp.float32)  # no effect (see notes above)

    out = transformer_block(key_in, query, value, mask, params, heads)
    out = jax.block_until_ready(out)

    ref = reference_transformer_block(key_in, query, value, params, heads)
    max_err = float(jnp.max(jnp.abs(out - ref)))
    # bf16 MXU matmuls + EUP approx reciprocal in softmax -> relaxed tolerance.
    assert jnp.allclose(out, ref, atol=2e-2, rtol=2e-2), f"max_err={max_err}"
    print("KERNEL_OK")
</pallas_src>

<mosaic_0001>
module attributes {stable_mosaic.version = 11 : i64} {
  func.func @kernel(%arg0: i32, %arg1: memref<2x8x128xf32, #tpu.memory_space<vmem>>, %arg2: memref<2x8x128xf32, #tpu.memory_space<vmem>>, %arg3: memref<2x8x128xf32, #tpu.memory_space<vmem>>, %arg4: memref<128x32xbf16, #tpu.memory_space<vmem>>, %arg5: memref<128x32xbf16, #tpu.memory_space<vmem>>, %arg6: memref<128x32xbf16, #tpu.memory_space<vmem>>, %arg7: memref<32x128xbf16, #tpu.memory_space<vmem>>, %arg8: memref<128x128xbf16, #tpu.memory_space<vmem>>, %arg9: memref<128x128xbf16, #tpu.memory_space<vmem>>, %arg10: memref<8x128xf32, #tpu.memory_space<vmem>>, %arg11: memref<2x8x128xf32, #tpu.memory_space<vmem>>) attributes {dimension_semantics = [#tpu.dimension_semantics<parallel>], iteration_bounds = array<i64: 1>, scalar_prefetch = 0 : i64, scratch_operands = 0 : i64, tpu.core_type = #tpu.core_type<tc>, window_params = [{transform_indices = @transform_0, window_bounds = array<i64: 2, 8, 128>}, {transform_indices = @transform_1, window_bounds = array<i64: 2, 8, 128>}, {transform_indices = @transform_2, window_bounds = array<i64: 2, 8, 128>}, {pipeline_mode = #tpu.pipeline_mode<synchronous>, transform_indices = @transform_3, window_bounds = array<i64: 128, 32>}, {pipeline_mode = #tpu.pipeline_mode<synchronous>, transform_indices = @transform_4, window_bounds = array<i64: 128, 32>}, {pipeline_mode = #tpu.pipeline_mode<synchronous>, transform_indices = @transform_5, window_bounds = array<i64: 128, 32>}, {pipeline_mode = #tpu.pipeline_mode<synchronous>, transform_indices = @transform_6, window_bounds = array<i64: 32, 128>}, {pipeline_mode = #tpu.pipeline_mode<synchronous>, transform_indices = @transform_7, window_bounds = array<i64: 128, 128>}, {pipeline_mode = #tpu.pipeline_mode<synchronous>, transform_indices = @transform_8, window_bounds = array<i64: 128, 128>}, {pipeline_mode = #tpu.pipeline_mode<synchronous>, transform_indices = @transform_9, window_bounds = array<i64: 8, 128>}, {transform_indices = @transform_10, window_bounds = array<i64: 2, 8, 128>}]} {
    %c0 = arith.constant 0 : index
    %c0_0 = arith.constant 0 : index
    %c0_1 = arith.constant 0 : index
    %0 = vector.load %arg2[%c0, %c0_0, %c0_1] : memref<2x8x128xf32, #tpu.memory_space<vmem>>, vector<2x8x128xf32>
    %1 = vector.shape_cast %0 : vector<2x8x128xf32> to vector<16x128xf32>
    %c0_2 = arith.constant 0 : index
    %c0_3 = arith.constant 0 : index
    %c0_4 = arith.constant 0 : index
    %2 = vector.load %arg1[%c0_2, %c0_3, %c0_4] : memref<2x8x128xf32, #tpu.memory_space<vmem>>, vector<2x8x128xf32>
    %3 = vector.shape_cast %2 : vector<2x8x128xf32> to vector<16x128xf32>
    %c0_5 = arith.constant 0 : index
    %c0_6 = arith.constant 0 : index
    %c0_7 = arith.constant 0 : index
    %4 = vector.load %arg3[%c0_5, %c0_6, %c0_7] : memref<2x8x128xf32, #tpu.memory_space<vmem>>, vector<2x8x128xf32>
    %5 = vector.shape_cast %4 : vector<2x8x128xf32> to vector<16x128xf32>
    %6 = arith.truncf %1 : vector<16x128xf32> to vector<16x128xbf16>
    %c0_8 = arith.constant 0 : index
    %c0_9 = arith.constant 0 : index
    %7 = vector.load %arg4[%c0_8, %c0_9] : memref<128x32xbf16, #tpu.memory_space<vmem>>, vector<128x32xbf16>
    %cst = arith.constant dense<0.000000e+00> : vector<16x32xf32>
    %8 = tpu.matmul %6, %7, %cst {dimension_numbers = #tpu.dot_dimension_numbers<[1], [0], [0], [1], [0, 0, 1, 1], [], []>} : vector<16x128xbf16>, vector<128x32xbf16>, vector<16x32xf32> -> vector<16x32xf32>
    %9 = arith.truncf %3 : vector<16x128xf32> to vector<16x128xbf16>
    %c0_10 = arith.constant 0 : index
    %c0_11 = arith.constant 0 : index
    %10 = vector.load %arg5[%c0_10, %c0_11] : memref<128x32xbf16, #tpu.memory_space<vmem>>, vector<128x32xbf16>
    %cst_12 = arith.constant dense<0.000000e+00> : vector<16x32xf32>
    %11 = tpu.matmul %9, %10, %cst_12 {dimension_numbers = #tpu.dot_dimension_numbers<[1], [0], [0], [1], [0, 0, 1, 1], [], []>} : vector<16x128xbf16>, vector<128x32xbf16>, vector<16x32xf32> -> vector<16x32xf32>
    %12 = arith.truncf %5 : vector<16x128xf32> to vector<16x128xbf16>
    %c0_13 = arith.constant 0 : index
    %c0_14 = arith.constant 0 : index
    %13 = vector.load %arg6[%c0_13, %c0_14] : memref<128x32xbf16, #tpu.memory_space<vmem>>, vector<128x32xbf16>
    %cst_15 = arith.constant dense<0.000000e+00> : vector<16x32xf32>
    %14 = tpu.matmul %12, %13, %cst_15 {dimension_numbers = #tpu.dot_dimension_numbers<[1], [0], [0], [1], [0, 0, 1, 1], [], []>} : vector<16x128xbf16>, vector<128x32xbf16>, vector<16x32xf32> -> vector<16x32xf32>
    %15 = vector.shape_cast %8 : vector<16x32xf32> to vector<2x8x32xf32>
    %16 = vector.extract_strided_slice %15 {offsets = [0, 0, 0], sizes = [2, 8, 8], strides = [1, 1, 1]} : vector<2x8x32xf32> to vector<2x8x8xf32>
    %17 = vector.extract_strided_slice %15 {offsets = [0, 0, 8], sizes = [2, 8, 8], strides = [1, 1, 1]} : vector<2x8x32xf32> to vector<2x8x8xf32>
    %18 = vector.extract_strided_slice %15 {offsets = [0, 0, 16], sizes = [2, 8, 8], strides = [1, 1, 1]} : vector<2x8x32xf32> to vector<2x8x8xf32>
    %19 = vector.extract_strided_slice %15 {offsets = [0, 0, 24], sizes = [2, 8, 8], strides = [1, 1, 1]} : vector<2x8x32xf32> to vector<2x8x8xf32>
    %20 = tpu.concatenate %16, %17, %18, %19 in 0 : vector<2x8x8xf32>, vector<2x8x8xf32>, vector<2x8x8xf32>, vector<2x8x8xf32> -> vector<8x8x8xf32>
    %21 = vector.shape_cast %11 : vector<16x32xf32> to vector<2x8x32xf32>
    %22 = vector.extract_strided_slice %21 {offsets = [0, 0, 0], sizes = [2, 8, 8], strides = [1, 1, 1]} : vector<2x8x32xf32> to vector<2x8x8xf32>
    %23 = vector.extract_strided_slice %21 {offsets = [0, 0, 8], sizes = [2, 8, 8], strides = [1, 1, 1]} : vector<2x8x32xf32> to vector<2x8x8xf32>
    %24 = vector.extract_strided_slice %21 {offsets = [0, 0, 16], sizes = [2, 8, 8], strides = [1, 1, 1]} : vector<2x8x32xf32> to vector<2x8x8xf32>
    %25 = vector.extract_strided_slice %21 {offsets = [0, 0, 24], sizes = [2, 8, 8], strides = [1, 1, 1]} : vector<2x8x32xf32> to vector<2x8x8xf32>
    %26 = tpu.concatenate %22, %23, %24, %25 in 0 : vector<2x8x8xf32>, vector<2x8x8xf32>, vector<2x8x8xf32>, vector<2x8x8xf32> -> vector<8x8x8xf32>
    %27 = vector.shape_cast %14 : vector<16x32xf32> to vector<2x8x32xf32>
    %28 = vector.extract_strided_slice %27 {offsets = [0, 0, 0], sizes = [2, 8, 8], strides = [1, 1, 1]} : vector<2x8x32xf32> to vector<2x8x8xf32>
    %29 = vector.extract_strided_slice %27 {offsets = [0, 0, 8], sizes = [2, 8, 8], strides = [1, 1, 1]} : vector<2x8x32xf32> to vector<2x8x8xf32>
    %30 = vector.extract_strided_slice %27 {offsets = [0, 0, 16], sizes = [2, 8, 8], strides = [1, 1, 1]} : vector<2x8x32xf32> to vector<2x8x8xf32>
    %31 = vector.extract_strided_slice %27 {offsets = [0, 0, 24], sizes = [2, 8, 8], strides = [1, 1, 1]} : vector<2x8x32xf32> to vector<2x8x8xf32>
    %32 = tpu.concatenate %28, %29, %30, %31 in 0 : vector<2x8x8xf32>, vector<2x8x8xf32>, vector<2x8x8xf32>, vector<2x8x8xf32> -> vector<8x8x8xf32>
    %33 = arith.truncf %20 : vector<8x8x8xf32> to vector<8x8x8xbf16>
    %34 = arith.truncf %26 : vector<8x8x8xf32> to vector<8x8x8xbf16>
    %cst_16 = arith.constant dense<0.000000e+00> : vector<8x8x8xf32>
    %35 = tpu.matmul %33, %34, %cst_16 {dimension_numbers = #tpu.dot_dimension_numbers<[2], [2], [1], [1], [0, 0, 0, 1, 1, 1], [0], [0]>} : vector<8x8x8xbf16>, vector<8x8x8xbf16>, vector<8x8x8xf32> -> vector<8x8x8xf32>
    %cst_17 = arith.constant dense<0xFF800000> : vector<8x8xf32>
    %36 = vector.multi_reduction <maximumf>, %35, %cst_17 [2] : vector<8x8x8xf32> to vector<8x8xf32>
    %37 = vector.shape_cast %36 : vector<8x8xf32> to vector<8x8x1xf32>
    %38 = vector.broadcast %37 : vector<8x8x1xf32> to vector<8x8x8xf32>
    %39 = arith.subf %35, %38 : vector<8x8x8xf32>
    %40 = math.exp %39 : vector<8x8x8xf32>
    %cst_18 = arith.constant dense<0.000000e+00> : vector<8x8xf32>
    %41 = vector.multi_reduction <add>, %40, %cst_18 [2] : vector<8x8x8xf32> to vector<8x8xf32>
    %42 = vector.shape_cast %41 : vector<8x8xf32> to vector<8x8x1xf32>
    %43 = tpu.reciprocal %42 {approx = true} : vector<8x8x1xf32> -> vector<8x8x1xf32>
    %44 = vector.broadcast %43 : vector<8x8x1xf32> to vector<8x8x8xf32>
    %45 = arith.mulf %40, %44 : vector<8x8x8xf32>
    %46 = arith.truncf %45 : vector<8x8x8xf32> to vector<8x8x8xbf16>
    %47 = arith.truncf %32 : vector<8x8x8xf32> to vector<8x8x8xbf16>
    %cst_19 = arith.constant dense<0.000000e+00> : vector<8x8x8xf32>
    %48 = tpu.matmul %46, %47, %cst_19 {dimension_numbers = #tpu.dot_dimension_numbers<[2], [1], [1], [2], [0, 0, 0, 1, 1, 2], [0], [0]>} : vector<8x8x8xbf16>, vector<8x8x8xbf16>, vector<8x8x8xf32> -> vector<8x8x8xf32>
    %49 = vector.extract_strided_slice %48 {offsets = [0, 0, 0], sizes = [2, 8, 8], strides = [1, 1, 1]} : vector<8x8x8xf32> to vector<2x8x8xf32>
    %50 = vector.extract_strided_slice %48 {offsets = [2, 0, 0], sizes = [2, 8, 8], strides = [1, 1, 1]} : vector<8x8x8xf32> to vector<2x8x8xf32>
    %51 = vector.extract_strided_slice %48 {offsets = [4, 0, 0], sizes = [2, 8, 8], strides = [1, 1, 1]} : vector<8x8x8xf32> to vector<2x8x8xf32>
    %52 = vector.extract_strided_slice %48 {offsets = [6, 0, 0], sizes = [2, 8, 8], strides = [1, 1, 1]} : vector<8x8x8xf32> to vector<2x8x8xf32>
    %53 = tpu.concatenate %49, %50, %51, %52 in 2 : vector<2x8x8xf32>, vector<2x8x8xf32>, vector<2x8x8xf32>, vector<2x8x8xf32> -> vector<2x8x32xf32>
    %54 = vector.shape_cast %53 : vector<2x8x32xf32> to vector<16x32xf32>
    %55 = arith.truncf %54 : vector<16x32xf32> to vector<16x32xbf16>
    %c0_20 = arith.constant 0 : index
    %c0_21 = arith.constant 0 : index
    %56 = vector.load %arg7[%c0_20, %c0_21] : memref<32x128xbf16, #tpu.memory_space<vmem>>, vector<32x128xbf16>
    %cst_22 = arith.constant dense<0.000000e+00> : vector<16x128xf32>
    %57 = tpu.matmul %55, %56, %cst_22 {dimension_numbers = #tpu.dot_dimension_numbers<[1], [0], [0], [1], [0, 0, 1, 1], [], []>} : vector<16x32xbf16>, vector<32x128xbf16>, vector<16x128xf32> -> vector<16x128xf32>
    %c0_23 = arith.constant 0 : index
    %c0_24 = arith.constant 0 : index
    %58 = vector.load %arg10[%c0_23, %c0_24] : memref<8x128xf32, #tpu.memory_space<vmem>>, vector<1x128xf32>
    %c1 = arith.constant 1 : index
    %c0_25 = arith.constant 0 : index
    %59 = vector.load %arg10[%c1, %c0_25] : memref<8x128xf32, #tpu.memory_space<vmem>>, vector<1x128xf32>
    %c2 = arith.constant 2 : index
    %c0_26 = arith.constant 0 : index
    %60 = vector.load %arg10[%c2, %c0_26] : memref<8x128xf32, #tpu.memory_space<vmem>>, vector<1x128xf32>
    %c3 = arith.constant 3 : index
    %c0_27 = arith.constant 0 : index
    %61 = vector.load %arg10[%c3, %c0_27] : memref<8x128xf32, #tpu.memory_space<vmem>>, vector<1x128xf32>
    %c4 = arith.constant 4 : index
    %c0_28 = arith.constant 0 : index
    %62 = vector.load %arg10[%c4, %c0_28] : memref<8x128xf32, #tpu.memory_space<vmem>>, vector<1x128xf32>
    %c5 = arith.constant 5 : index
    %c0_29 = arith.constant 0 : index
    %63 = vector.load %arg10[%c5, %c0_29] : memref<8x128xf32, #tpu.memory_space<vmem>>, vector<1x128xf32>
    %c6 = arith.constant 6 : index
    %c0_30 = arith.constant 0 : index
    %64 = vector.load %arg10[%c6, %c0_30] : memref<8x128xf32, #tpu.memory_space<vmem>>, vector<1x128xf32>
    %65 = arith.addf %1, %57 : vector<16x128xf32>
    %cst_31 = arith.constant dense<0.000000e+00> : vector<16xf32>
    %66 = vector.multi_reduction <add>, %65, %cst_31 [1] : vector<16x128xf32> to vector<16xf32>
    %67 = vector.shape_cast %66 : vector<16xf32> to vector<16x1xf32>
    %cst_32 = arith.constant 3.125000e-02 : f32
    %68 = vector.broadcast %cst_32 : f32 to vector<16x1xf32>
    %69 = arith.mulf %67, %68 : vector<16x1xf32>
    %70 = vector.broadcast %69 : vector<16x1xf32> to vector<16x128xf32>
    %71 = arith.subf %65, %70 : vector<16x128xf32>
    %72 = vector.broadcast %64 : vector<1x128xf32> to vector<16x128xf32>
    %73 = arith.mulf %71, %72 : vector<16x128xf32>
    %74 = arith.mulf %73, %73 : vector<16x128xf32>
    %cst_33 = arith.constant dense<0.000000e+00> : vector<16xf32>
    %75 = vector.multi_reduction <add>, %74, %cst_33 [1] : vector<16x128xf32> to vector<16xf32>
    %76 = vector.shape_cast %75 : vector<16xf32> to vector<16x1xf32>
    %cst_34 = arith.constant 3.125000e-02 : f32
    %77 = vector.broadcast %cst_34 : f32 to vector<16x1xf32>
    %78 = arith.mulf %76, %77 : vector<16x1xf32>
    %cst_35 = arith.constant 9.99999974E-6 : f32
    %79 = vector.broadcast %cst_35 : f32 to vector<16x1xf32>
    %80 = arith.addf %78, %79 : vector<16x1xf32>
    %81 = math.rsqrt %80 : vector<16x1xf32>
    %82 = vector.broadcast %81 : vector<16x1xf32> to vector<16x128xf32>
    %83 = arith.mulf %73, %82 : vector<16x128xf32>
    %84 = vector.broadcast %58 : vector<1x128xf32> to vector<16x128xf32>
    %85 = arith.mulf %83, %84 : vector<16x128xf32>
    %86 = vector.broadcast %59 : vector<1x128xf32> to vector<16x128xf32>
    %87 = arith.addf %85, %86 : vector<16x128xf32>
    %88 = arith.truncf %87 : vector<16x128xf32> to vector<16x128xbf16>
    %c0_36 = arith.constant 0 : index
    %c0_37 = arith.constant 0 : index
    %89 = vector.load %arg8[%c0_36, %c0_37] : memref<128x128xbf16, #tpu.memory_space<vmem>>, vector<128x128xbf16>
    %cst_38 = arith.constant dense<0.000000e+00> : vector<16x128xf32>
    %90 = tpu.matmul %88, %89, %cst_38 {dimension_numbers = #tpu.dot_dimension_numbers<[1], [0], [0], [1], [0, 0, 1, 1], [], []>} : vector<16x128xbf16>, vector<128x128xbf16>, vector<16x128xf32> -> vector<16x128xf32>
    %91 = vector.broadcast %63 : vector<1x128xf32> to vector<16x128xf32>
    %92 = arith.addf %90, %91 : vector<16x128xf32>
    %cst_39 = arith.constant 0.000000e+00 : f32
    %93 = vector.broadcast %cst_39 : f32 to vector<16x128xf32>
    %94 = arith.maximumf %92, %93 : vector<16x128xf32>
    %95 = arith.truncf %94 : vector<16x128xf32> to vector<16x128xbf16>
    %c0_40 = arith.constant 0 : index
    %c0_41 = arith.constant 0 : index
    %96 = vector.load %arg9[%c0_40, %c0_41] : memref<128x128xbf16, #tpu.memory_space<vmem>>, vector<128x128xbf16>
    %cst_42 = arith.constant dense<0.000000e+00> : vector<16x128xf32>
    %97 = tpu.matmul %95, %96, %cst_42 {dimension_numbers = #tpu.dot_dimension_numbers<[1], [0], [0], [1], [0, 0, 1, 1], [], []>} : vector<16x128xbf16>, vector<128x128xbf16>, vector<16x128xf32> -> vector<16x128xf32>
    %98 = vector.broadcast %62 : vector<1x128xf32> to vector<16x128xf32>
    %99 = arith.addf %97, %98 : vector<16x128xf32>
    %100 = arith.addf %99, %87 : vector<16x128xf32>
    %cst_43 = arith.constant dense<0.000000e+00> : vector<16xf32>
    %101 = vector.multi_reduction <add>, %100, %cst_43 [1] : vector<16x128xf32> to vector<16xf32>
    %102 = vector.shape_cast %101 : vector<16xf32> to vector<16x1xf32>
    %cst_44 = arith.constant 3.125000e-02 : f32
    %103 = vector.broadcast %cst_44 : f32 to vector<16x1xf32>
    %104 = arith.mulf %102, %103 : vector<16x1xf32>
    %105 = vector.broadcast %104 : vector<16x1xf32> to vector<16x128xf32>
    %106 = arith.subf %100, %105 : vector<16x128xf32>
    %107 = vector.broadcast %64 : vector<1x128xf32> to vector<16x128xf32>
    %108 = arith.mulf %106, %107 : vector<16x128xf32>
    %109 = arith.mulf %108, %108 : vector<16x128xf32>
    %cst_45 = arith.constant dense<0.000000e+00> : vector<16xf32>
    %110 = vector.multi_reduction <add>, %109, %cst_45 [1] : vector<16x128xf32> to vector<16xf32>
    %111 = vector.shape_cast %110 : vector<16xf32> to vector<16x1xf32>
    %cst_46 = arith.constant 3.125000e-02 : f32
    %112 = vector.broadcast %cst_46 : f32 to vector<16x1xf32>
    %113 = arith.mulf %111, %112 : vector<16x1xf32>
    %cst_47 = arith.constant 9.99999974E-6 : f32
    %114 = vector.broadcast %cst_47 : f32 to vector<16x1xf32>
    %115 = arith.addf %113, %114 : vector<16x1xf32>
    %116 = math.rsqrt %115 : vector<16x1xf32>
    %117 = vector.broadcast %116 : vector<16x1xf32> to vector<16x128xf32>
    %118 = arith.mulf %108, %117 : vector<16x128xf32>
    %119 = vector.broadcast %60 : vector<1x128xf32> to vector<16x128xf32>
    %120 = arith.mulf %118, %119 : vector<16x128xf32>
    %121 = vector.broadcast %61 : vector<1x128xf32> to vector<16x128xf32>
    %122 = arith.addf %120, %121 : vector<16x128xf32>
    %123 = vector.shape_cast %122 : vector<16x128xf32> to vector<2x8x128xf32>
    %c0_48 = arith.constant 0 : index
    %c0_49 = arith.constant 0 : index
    %c0_50 = arith.constant 0 : index
    %124 = vector.load %arg11[%c0_48, %c0_49, %c0_50] : memref<2x8x128xf32, #tpu.memory_space<vmem>>, vector<2x8x128xf32>
    tpu.vector_store %arg11[%c0_48, %c0_49, %c0_50], %123 {strides = array<i32>} : memref<2x8x128xf32, #tpu.memory_space<vmem>>, vector<2x8x128xf32>,
    return
  }
  func.func @transform_0(%arg0: i32) -> (i32, i32, i32) {
    %c0_i32 = arith.constant 0 : i32
    %c0_i32_0 = arith.constant 0 : i32
    %c0_i32_1 = arith.constant 0 : i32
    return %arg0, %c0_i32, %c0_i32_0 : i32, i32, i32
  }
  func.func @transform_1(%arg0: i32) -> (i32, i32, i32) {
    %c0_i32 = arith.constant 0 : i32
    %c0_i32_0 = arith.constant 0 : i32
    %c0_i32_1 = arith.constant 0 : i32
    return %arg0, %c0_i32, %c0_i32_0 : i32, i32, i32
  }
  func.func @transform_2(%arg0: i32) -> (i32, i32, i32) {
    %c0_i32 = arith.constant 0 : i32
    %c0_i32_0 = arith.constant 0 : i32
    %c0_i32_1 = arith.constant 0 : i32
    return %arg0, %c0_i32, %c0_i32_0 : i32, i32, i32
  }
  func.func @transform_3(%arg0: i32) -> (i32, i32) {
    %c0_i32 = arith.constant 0 : i32
    %c0_i32_0 = arith.constant 0 : i32
    %c0_i32_1 = arith.constant 0 : i32
    return %c0_i32, %c0_i32_0 : i32, i32
  }
  func.func @transform_4(%arg0: i32) -> (i32, i32) {
    %c0_i32 = arith.constant 0 : i32
    %c0_i32_0 = arith.constant 0 : i32
    %c0_i32_1 = arith.constant 0 : i32
    return %c0_i32, %c0_i32_0 : i32, i32
  }
  func.func @transform_5(%arg0: i32) -> (i32, i32) {
    %c0_i32 = arith.constant 0 : i32
    %c0_i32_0 = arith.constant 0 : i32
    %c0_i32_1 = arith.constant 0 : i32
    return %c0_i32, %c0_i32_0 : i32, i32
  }
  func.func @transform_6(%arg0: i32) -> (i32, i32) {
    %c0_i32 = arith.constant 0 : i32
    %c0_i32_0 = arith.constant 0 : i32
    %c0_i32_1 = arith.constant 0 : i32
    return %c0_i32, %c0_i32_0 : i32, i32
  }
  func.func @transform_7(%arg0: i32) -> (i32, i32) {
    %c0_i32 = arith.constant 0 : i32
    %c0_i32_0 = arith.constant 0 : i32
    %c0_i32_1 = arith.constant 0 : i32
    return %c0_i32, %c0_i32_0 : i32, i32
  }
  func.func @transform_8(%arg0: i32) -> (i32, i32) {
    %c0_i32 = arith.constant 0 : i32
    %c0_i32_0 = arith.constant 0 : i32
    %c0_i32_1 = arith.constant 0 : i32
    return %c0_i32, %c0_i32_0 : i32, i32
  }
  func.func @transform_9(%arg0: i32) -> (i32, i32) {
    %c0_i32 = arith.constant 0 : i32
    %c0_i32_0 = arith.constant 0 : i32
    %c0_i32_1 = arith.constant 0 : i32
    return %c0_i32, %c0_i32_0 : i32, i32
  }
  func.func @transform_10(%arg0: i32) -> (i32, i32, i32) {
    %c0_i32 = arith.constant 0 : i32
    %c0_i32_0 = arith.constant 0 : i32
    %c0_i32_1 = arith.constant 0 : i32
    return %arg0, %c0_i32, %c0_i32_0 : i32, i32, i32
  }
}

module attributes {stable_mosaic.version = 11 : i64} {
  func.func @kernel(%arg0: i32, %arg1: memref<2x8x128xf32, #tpu.memory_space<vmem>>, %arg2: memref<2x8x128xf32, #tpu.memory_space<vmem>>, %arg3: memref<2x8x128xf32, #tpu.memory_space<vmem>>, %arg4: memref<128x32xbf16, #tpu.memory_space<vmem>>, %arg5: memref<128x32xbf16, #tpu.memory_space<vmem>>, %arg6: memref<128x32xbf16, #tpu.memory_space<vmem>>, %arg7: memref<32x128xbf16, #tpu.memory_space<vmem>>, %arg8: memref<128x128xbf16, #tpu.memory_space<vmem>>, %arg9: memref<128x128xbf16, #tpu.memory_space<vmem>>, %arg10: memref<8x128xf32, #tpu.memory_space<vmem>>, %arg11: memref<2x8x128xf32, #tpu.memory_space<vmem>>) attributes {dimension_semantics = [#tpu.dimension_semantics<parallel>], iteration_bounds = array<i64: 1>, scalar_prefetch = 0 : i64, scratch_operands = 0 : i64, tpu.core_type = #tpu.core_type<tc>, window_params = [{transform_indices = @transform_0, window_bounds = array<i64: 2, 8, 128>}, {transform_indices = @transform_1, window_bounds = array<i64: 2, 8, 128>}, {transform_indices = @transform_2, window_bounds = array<i64: 2, 8, 128>}, {pipeline_mode = #tpu.pipeline_mode<synchronous>, transform_indices = @transform_3, window_bounds = array<i64: 128, 32>}, {pipeline_mode = #tpu.pipeline_mode<synchronous>, transform_indices = @transform_4, window_bounds = array<i64: 128, 32>}, {pipeline_mode = #tpu.pipeline_mode<synchronous>, transform_indices = @transform_5, window_bounds = array<i64: 128, 32>}, {pipeline_mode = #tpu.pipeline_mode<synchronous>, transform_indices = @transform_6, window_bounds = array<i64: 32, 128>}, {pipeline_mode = #tpu.pipeline_mode<synchronous>, transform_indices = @transform_7, window_bounds = array<i64: 128, 128>}, {pipeline_mode = #tpu.pipeline_mode<synchronous>, transform_indices = @transform_8, window_bounds = array<i64: 128, 128>}, {pipeline_mode = #tpu.pipeline_mode<synchronous>, transform_indices = @transform_9, window_bounds = array<i64: 8, 128>}, {transform_indices = @transform_10, window_bounds = array<i64: 2, 8, 128>}]} {
    %c0 = arith.constant 0 : index
    %c0_0 = arith.constant 0 : index
    %c0_1 = arith.constant 0 : index
    %0 = vector.load %arg2[%c0, %c0_0, %c0_1] : memref<2x8x128xf32, #tpu.memory_space<vmem>>, vector<2x8x128xf32>
    %1 = vector.shape_cast %0 : vector<2x8x128xf32> to vector<16x128xf32>
    %c0_2 = arith.constant 0 : index
    %c0_3 = arith.constant 0 : index
    %c0_4 = arith.constant 0 : index
    %2 = vector.load %arg1[%c0_2, %c0_3, %c0_4] : memref<2x8x128xf32, #tpu.memory_space<vmem>>, vector<2x8x128xf32>
    %3 = vector.shape_cast %2 : vector<2x8x128xf32> to vector<16x128xf32>
    %c0_5 = arith.constant 0 : index
    %c0_6 = arith.constant 0 : index
    %c0_7 = arith.constant 0 : index
    %4 = vector.load %arg3[%c0_5, %c0_6, %c0_7] : memref<2x8x128xf32, #tpu.memory_space<vmem>>, vector<2x8x128xf32>
    %5 = vector.shape_cast %4 : vector<2x8x128xf32> to vector<16x128xf32>
    %6 = arith.truncf %1 : vector<16x128xf32> to vector<16x128xbf16>
    %c0_8 = arith.constant 0 : index
    %c0_9 = arith.constant 0 : index
    %7 = vector.load %arg4[%c0_8, %c0_9] : memref<128x32xbf16, #tpu.memory_space<vmem>>, vector<128x32xbf16>
    %cst = arith.constant dense<0.000000e+00> : vector<16x32xf32>
    %8 = tpu.matmul %6, %7, %cst {dimension_numbers = #tpu.dot_dimension_numbers<[1], [0], [0], [1], [0, 0, 1, 1], [], []>} : vector<16x128xbf16>, vector<128x32xbf16>, vector<16x32xf32> -> vector<16x32xf32>
    %9 = arith.truncf %3 : vector<16x128xf32> to vector<16x128xbf16>
    %c0_10 = arith.constant 0 : index
    %c0_11 = arith.constant 0 : index
    %10 = vector.load %arg5[%c0_10, %c0_11] : memref<128x32xbf16, #tpu.memory_space<vmem>>, vector<128x32xbf16>
    %cst_12 = arith.constant dense<0.000000e+00> : vector<16x32xf32>
    %11 = tpu.matmul %9, %10, %cst_12 {dimension_numbers = #tpu.dot_dimension_numbers<[1], [0], [0], [1], [0, 0, 1, 1], [], []>} : vector<16x128xbf16>, vector<128x32xbf16>, vector<16x32xf32> -> vector<16x32xf32>
    %12 = arith.truncf %5 : vector<16x128xf32> to vector<16x128xbf16>
    %c0_13 = arith.constant 0 : index
    %c0_14 = arith.constant 0 : index
    %13 = vector.load %arg6[%c0_13, %c0_14] : memref<128x32xbf16, #tpu.memory_space<vmem>>, vector<128x32xbf16>
    %cst_15 = arith.constant dense<0.000000e+00> : vector<16x32xf32>
    %14 = tpu.matmul %12, %13, %cst_15 {dimension_numbers = #tpu.dot_dimension_numbers<[1], [0], [0], [1], [0, 0, 1, 1], [], []>} : vector<16x128xbf16>, vector<128x32xbf16>, vector<16x32xf32> -> vector<16x32xf32>
    %15 = vector.shape_cast %8 : vector<16x32xf32> to vector<2x8x32xf32>
    %16 = vector.extract_strided_slice %15 {offsets = [0, 0, 0], sizes = [2, 8, 8], strides = [1, 1, 1]} : vector<2x8x32xf32> to vector<2x8x8xf32>
    %17 = vector.extract_strided_slice %15 {offsets = [0, 0, 8], sizes = [2, 8, 8], strides = [1, 1, 1]} : vector<2x8x32xf32> to vector<2x8x8xf32>
    %18 = vector.extract_strided_slice %15 {offsets = [0, 0, 16], sizes = [2, 8, 8], strides = [1, 1, 1]} : vector<2x8x32xf32> to vector<2x8x8xf32>
    %19 = vector.extract_strided_slice %15 {offsets = [0, 0, 24], sizes = [2, 8, 8], strides = [1, 1, 1]} : vector<2x8x32xf32> to vector<2x8x8xf32>
    %20 = tpu.concatenate %16, %17, %18, %19 in 0 : vector<2x8x8xf32>, vector<2x8x8xf32>, vector<2x8x8xf32>, vector<2x8x8xf32> -> vector<8x8x8xf32>
    %21 = vector.shape_cast %11 : vector<16x32xf32> to vector<2x8x32xf32>
    %22 = vector.extract_strided_slice %21 {offsets = [0, 0, 0], sizes = [2, 8, 8], strides = [1, 1, 1]} : vector<2x8x32xf32> to vector<2x8x8xf32>
    %23 = vector.extract_strided_slice %21 {offsets = [0, 0, 8], sizes = [2, 8, 8], strides = [1, 1, 1]} : vector<2x8x32xf32> to vector<2x8x8xf32>
    %24 = vector.extract_strided_slice %21 {offsets = [0, 0, 16], sizes = [2, 8, 8], strides = [1, 1, 1]} : vector<2x8x32xf32> to vector<2x8x8xf32>
    %25 = vector.extract_strided_slice %21 {offsets = [0, 0, 24], sizes = [2, 8, 8], strides = [1, 1, 1]} : vector<2x8x32xf32> to vector<2x8x8xf32>
    %26 = tpu.concatenate %22, %23, %24, %25 in 0 : vector<2x8x8xf32>, vector<2x8x8xf32>, vector<2x8x8xf32>, vector<2x8x8xf32> -> vector<8x8x8xf32>
    %27 = vector.shape_cast %14 : vector<16x32xf32> to vector<2x8x32xf32>
    %28 = vector.extract_strided_slice %27 {offsets = [0, 0, 0], sizes = [2, 8, 8], strides = [1, 1, 1]} : vector<2x8x32xf32> to vector<2x8x8xf32>
    %29 = vector.extract_strided_slice %27 {offsets = [0, 0, 8], sizes = [2, 8, 8], strides = [1, 1, 1]} : vector<2x8x32xf32> to vector<2x8x8xf32>
    %30 = vector.extract_strided_slice %27 {offsets = [0, 0, 16], sizes = [2, 8, 8], strides = [1, 1, 1]} : vector<2x8x32xf32> to vector<2x8x8xf32>
    %31 = vector.extract_strided_slice %27 {offsets = [0, 0, 24], sizes = [2, 8, 8], strides = [1, 1, 1]} : vector<2x8x32xf32> to vector<2x8x8xf32>
    %32 = tpu.concatenate %28, %29, %30, %31 in 0 : vector<2x8x8xf32>, vector<2x8x8xf32>, vector<2x8x8xf32>, vector<2x8x8xf32> -> vector<8x8x8xf32>
    %33 = arith.truncf %20 : vector<8x8x8xf32> to vector<8x8x8xbf16>
    %34 = arith.truncf %26 : vector<8x8x8xf32> to vector<8x8x8xbf16>
    %cst_16 = arith.constant dense<0.000000e+00> : vector<8x8x8xf32>
    %35 = tpu.matmul %33, %34, %cst_16 {dimension_numbers = #tpu.dot_dimension_numbers<[2], [2], [1], [1], [0, 0, 0, 1, 1, 1], [0], [0]>} : vector<8x8x8xbf16>, vector<8x8x8xbf16>, vector<8x8x8xf32> -> vector<8x8x8xf32>
    %cst_17 = arith.constant dense<0xFF800000> : vector<8x8xf32>
    %36 = vector.multi_reduction <maximumf>, %35, %cst_17 [2] : vector<8x8x8xf32> to vector<8x8xf32>
    %37 = vector.shape_cast %36 : vector<8x8xf32> to vector<8x8x1xf32>
    %38 = vector.broadcast %37 : vector<8x8x1xf32> to vector<8x8x8xf32>
    %39 = arith.subf %35, %38 : vector<8x8x8xf32>
    %40 = math.exp %39 : vector<8x8x8xf32>
    %cst_18 = arith.constant dense<0.000000e+00> : vector<8x8xf32>
    %41 = vector.multi_reduction <add>, %40, %cst_18 [2] : vector<8x8x8xf32> to vector<8x8xf32>
    %42 = vector.shape_cast %41 : vector<8x8xf32> to vector<8x8x1xf32>
    %43 = tpu.reciprocal %42 {approx = true} : vector<8x8x1xf32> -> vector<8x8x1xf32>
    %44 = vector.broadcast %43 : vector<8x8x1xf32> to vector<8x8x8xf32>
    %45 = arith.mulf %40, %44 : vector<8x8x8xf32>
    %46 = arith.truncf %45 : vector<8x8x8xf32> to vector<8x8x8xbf16>
    %47 = arith.truncf %32 : vector<8x8x8xf32> to vector<8x8x8xbf16>
    %cst_19 = arith.constant dense<0.000000e+00> : vector<8x8x8xf32>
    %48 = tpu.matmul %46, %47, %cst_19 {dimension_numbers = #tpu.dot_dimension_numbers<[2], [1], [1], [2], [0, 0, 0, 1, 1, 2], [0], [0]>} : vector<8x8x8xbf16>, vector<8x8x8xbf16>, vector<8x8x8xf32> -> vector<8x8x8xf32>
    %49 = vector.extract_strided_slice %48 {offsets = [0, 0, 0], sizes = [2, 8, 8], strides = [1, 1, 1]} : vector<8x8x8xf32> to vector<2x8x8xf32>
    %50 = vector.extract_strided_slice %48 {offsets = [2, 0, 0], sizes = [2, 8, 8], strides = [1, 1, 1]} : vector<8x8x8xf32> to vector<2x8x8xf32>
    %51 = vector.extract_strided_slice %48 {offsets = [4, 0, 0], sizes = [2, 8, 8], strides = [1, 1, 1]} : vector<8x8x8xf32> to vector<2x8x8xf32>
    %52 = vector.extract_strided_slice %48 {offsets = [6, 0, 0], sizes = [2, 8, 8], strides = [1, 1, 1]} : vector<8x8x8xf32> to vector<2x8x8xf32>
    %53 = tpu.concatenate %49, %50, %51, %52 in 2 : vector<2x8x8xf32>, vector<2x8x8xf32>, vector<2x8x8xf32>, vector<2x8x8xf32> -> vector<2x8x32xf32>
    %54 = vector.shape_cast %53 : vector<2x8x32xf32> to vector<16x32xf32>
    %55 = arith.truncf %54 : vector<16x32xf32> to vector<16x32xbf16>
    %c0_20 = arith.constant 0 : index
    %c0_21 = arith.constant 0 : index
    %56 = vector.load %arg7[%c0_20, %c0_21] : memref<32x128xbf16, #tpu.memory_space<vmem>>, vector<32x128xbf16>
    %cst_22 = arith.constant dense<0.000000e+00> : vector<16x128xf32>
    %57 = tpu.matmul %55, %56, %cst_22 {dimension_numbers = #tpu.dot_dimension_numbers<[1], [0], [0], [1], [0, 0, 1, 1], [], []>} : vector<16x32xbf16>, vector<32x128xbf16>, vector<16x128xf32> -> vector<16x128xf32>
    %c0_23 = arith.constant 0 : index
    %c0_24 = arith.constant 0 : index
    %58 = vector.load %arg10[%c0_23, %c0_24] : memref<8x128xf32, #tpu.memory_space<vmem>>, vector<1x128xf32>
    %c1 = arith.constant 1 : index
    %c0_25 = arith.constant 0 : index
    %59 = vector.load %arg10[%c1, %c0_25] : memref<8x128xf32, #tpu.memory_space<vmem>>, vector<1x128xf32>
    %c2 = arith.constant 2 : index
    %c0_26 = arith.constant 0 : index
    %60 = vector.load %arg10[%c2, %c0_26] : memref<8x128xf32, #tpu.memory_space<vmem>>, vector<1x128xf32>
    %c3 = arith.constant 3 : index
    %c0_27 = arith.constant 0 : index
    %61 = vector.load %arg10[%c3, %c0_27] : memref<8x128xf32, #tpu.memory_space<vmem>>, vector<1x128xf32>
    %c4 = arith.constant 4 : index
    %c0_28 = arith.constant 0 : index
    %62 = vector.load %arg10[%c4, %c0_28] : memref<8x128xf32, #tpu.memory_space<vmem>>, vector<1x128xf32>
    %c5 = arith.constant 5 : index
    %c0_29 = arith.constant 0 : index
    %63 = vector.load %arg10[%c5, %c0_29] : memref<8x128xf32, #tpu.memory_space<vmem>>, vector<1x128xf32>
    %c6 = arith.constant 6 : index
    %c0_30 = arith.constant 0 : index
    %64 = vector.load %arg10[%c6, %c0_30] : memref<8x128xf32, #tpu.memory_space<vmem>>, vector<1x128xf32>
    %65 = arith.addf %1, %57 : vector<16x128xf32>
    %cst_31 = arith.constant dense<0.000000e+00> : vector<16xf32>
    %66 = vector.multi_reduction <add>, %65, %cst_31 [1] : vector<16x128xf32> to vector<16xf32>
    %67 = vector.shape_cast %66 : vector<16xf32> to vector<16x1xf32>
    %cst_32 = arith.constant 3.125000e-02 : f32
    %68 = vector.broadcast %cst_32 : f32 to vector<16x1xf32>
    %69 = arith.mulf %67, %68 : vector<16x1xf32>
    %70 = vector.broadcast %69 : vector<16x1xf32> to vector<16x128xf32>
    %71 = arith.subf %65, %70 : vector<16x128xf32>
    %72 = vector.broadcast %64 : vector<1x128xf32> to vector<16x128xf32>
    %73 = arith.mulf %71, %72 : vector<16x128xf32>
    %74 = arith.mulf %73, %73 : vector<16x128xf32>
    %cst_33 = arith.constant dense<0.000000e+00> : vector<16xf32>
    %75 = vector.multi_reduction <add>, %74, %cst_33 [1] : vector<16x128xf32> to vector<16xf32>
    %76 = vector.shape_cast %75 : vector<16xf32> to vector<16x1xf32>
    %cst_34 = arith.constant 3.125000e-02 : f32
    %77 = vector.broadcast %cst_34 : f32 to vector<16x1xf32>
    %78 = arith.mulf %76, %77 : vector<16x1xf32>
    %cst_35 = arith.constant 9.99999974E-6 : f32
    %79 = vector.broadcast %cst_35 : f32 to vector<16x1xf32>
    %80 = arith.addf %78, %79 : vector<16x1xf32>
    %81 = math.rsqrt %80 : vector<16x1xf32>
    %82 = vector.broadcast %81 : vector<16x1xf32> to vector<16x128xf32>
    %83 = arith.mulf %73, %82 : vector<16x128xf32>
    %84 = vector.broadcast %58 : vector<1x128xf32> to vector<16x128xf32>
    %85 = arith.mulf %83, %84 : vector<16x128xf32>
    %86 = vector.broadcast %59 : vector<1x128xf32> to vector<16x128xf32>
    %87 = arith.addf %85, %86 : vector<16x128xf32>
    %88 = arith.truncf %87 : vector<16x128xf32> to vector<16x128xbf16>
    %c0_36 = arith.constant 0 : index
    %c0_37 = arith.constant 0 : index
    %89 = vector.load %arg8[%c0_36, %c0_37] : memref<128x128xbf16, #tpu.memory_space<vmem>>, vector<128x128xbf16>
    %cst_38 = arith.constant dense<0.000000e+00> : vector<16x128xf32>
    %90 = tpu.matmul %88, %89, %cst_38 {dimension_numbers = #tpu.dot_dimension_numbers<[1], [0], [0], [1], [0, 0, 1, 1], [], []>} : vector<16x128xbf16>, vector<128x128xbf16>, vector<16x128xf32> -> vector<16x128xf32>
    %91 = vector.broadcast %63 : vector<1x128xf32> to vector<16x128xf32>
    %92 = arith.addf %90, %91 : vector<16x128xf32>
    %cst_39 = arith.constant 0.000000e+00 : f32
    %93 = vector.broadcast %cst_39 : f32 to vector<16x128xf32>
    %94 = arith.maximumf %92, %93 : vector<16x128xf32>
    %95 = arith.truncf %94 : vector<16x128xf32> to vector<16x128xbf16>
    %c0_40 = arith.constant 0 : index
    %c0_41 = arith.constant 0 : index
    %96 = vector.load %arg9[%c0_40, %c0_41] : memref<128x128xbf16, #tpu.memory_space<vmem>>, vector<128x128xbf16>
    %cst_42 = arith.constant dense<0.000000e+00> : vector<16x128xf32>
    %97 = tpu.matmul %95, %96, %cst_42 {dimension_numbers = #tpu.dot_dimension_numbers<[1], [0], [0], [1], [0, 0, 1, 1], [], []>} : vector<16x128xbf16>, vector<128x128xbf16>, vector<16x128xf32> -> vector<16x128xf32>
    %98 = vector.broadcast %62 : vector<1x128xf32> to vector<16x128xf32>
    %99 = arith.addf %97, %98 : vector<16x128xf32>
    %100 = arith.addf %99, %87 : vector<16x128xf32>
    %cst_43 = arith.constant dense<0.000000e+00> : vector<16xf32>
    %101 = vector.multi_reduction <add>, %100, %cst_43 [1] : vector<16x128xf32> to vector<16xf32>
    %102 = vector.shape_cast %101 : vector<16xf32> to vector<16x1xf32>
    %cst_44 = arith.constant 3.125000e-02 : f32
    %103 = vector.broadcast %cst_44 : f32 to vector<16x1xf32>
    %104 = arith.mulf %102, %103 : vector<16x1xf32>
    %105 = vector.broadcast %104 : vector<16x1xf32> to vector<16x128xf32>
    %106 = arith.subf %100, %105 : vector<16x128xf32>
    %107 = vector.broadcast %64 : vector<1x128xf32> to vector<16x128xf32>
    %108 = arith.mulf %106, %107 : vector<16x128xf32>
    %109 = arith.mulf %108, %108 : vector<16x128xf32>
    %cst_45 = arith.constant dense<0.000000e+00> : vector<16xf32>
    %110 = vector.multi_reduction <add>, %109, %cst_45 [1] : vector<16x128xf32> to vector<16xf32>
    %111 = vector.shape_cast %110 : vector<16xf32> to vector<16x1xf32>
    %cst_46 = arith.constant 3.125000e-02 : f32
    %112 = vector.broadcast %cst_46 : f32 to vector<16x1xf32>
    %113 = arith.mulf %111, %112 : vector<16x1xf32>
    %cst_47 = arith.constant 9.99999974E-6 : f32
    %114 = vector.broadcast %cst_47 : f32 to vector<16x1xf32>
    %115 = arith.addf %113, %114 : vector<16x1xf32>
    %116 = math.rsqrt %115 : vector<16x1xf32>
    %117 = vector.broadcast %116 : vector<16x1xf32> to vector<16x128xf32>
    %118 = arith.mulf %108, %117 : vector<16x128xf32>
    %119 = vector.broadcast %60 : vector<1x128xf32> to vector<16x128xf32>
    %120 = arith.mulf %118, %119 : vector<16x128xf32>
    %121 = vector.broadcast %61 : vector<1x128xf32> to vector<16x128xf32>
    %122 = arith.addf %120, %121 : vector<16x128xf32>
    %123 = vector.shape_cast %122 : vector<16x128xf32> to vector<2x8x128xf32>
    %c0_48 = arith.constant 0 : index
    %c0_49 = arith.constant 0 : index
    %c0_50 = arith.constant 0 : index
    %124 = vector.load %arg11[%c0_48, %c0_49, %c0_50] : memref<2x8x128xf32, #tpu.memory_space<vmem>>, vector<2x8x128xf32>
    tpu.vector_store %arg11[%c0_48, %c0_49, %c0_50], %123 {strides = array<i32>} : memref<2x8x128xf32, #tpu.memory_space<vmem>>, vector<2x8x128xf32>,
    return
  }
  func.func @transform_0(%arg0: i32) -> (i32, i32, i32) {
    %c0_i32 = arith.constant 0 : i32
    %c0_i32_0 = arith.constant 0 : i32
    %c0_i32_1 = arith.constant 0 : i32
    return %arg0, %c0_i32, %c0_i32_0 : i32, i32, i32
  }
  func.func @transform_1(%arg0: i32) -> (i32, i32, i32) {
    %c0_i32 = arith.constant 0 : i32
    %c0_i32_0 = arith.constant 0 : i32
    %c0_i32_1 = arith.constant 0 : i32
    return %arg0, %c0_i32, %c0_i32_0 : i32, i32, i32
  }
  func.func @transform_2(%arg0: i32) -> (i32, i32, i32) {
    %c0_i32 = arith.constant 0 : i32
    %c0_i32_0 = arith.constant 0 : i32
    %c0_i32_1 = arith.constant 0 : i32
    return %arg0, %c0_i32, %c0_i32_0 : i32, i32, i32
  }
  func.func @transform_3(%arg0: i32) -> (i32, i32) {
    %c0_i32 = arith.constant 0 : i32
    %c0_i32_0 = arith.constant 0 : i32
    %c0_i32_1 = arith.constant 0 : i32
    return %c0_i32, %c0_i32_0 : i32, i32
  }
  func.func @transform_4(%arg0: i32) -> (i32, i32) {
    %c0_i32 = arith.constant 0 : i32
    %c0_i32_0 = arith.constant 0 : i32
    %c0_i32_1 = arith.constant 0 : i32
    return %c0_i32, %c0_i32_0 : i32, i32
  }
  func.func @transform_5(%arg0: i32) -> (i32, i32) {
    %c0_i32 = arith.constant 0 : i32
    %c0_i32_0 = arith.constant 0 : i32
    %c0_i32_1 = arith.constant 0 : i32
    return %c0_i32, %c0_i32_0 : i32, i32
  }
  func.func @transform_6(%arg0: i32) -> (i32, i32) {
    %c0_i32 = arith.constant 0 : i32
    %c0_i32_0 = arith.constant 0 : i32
    %c0_i32_1 = arith.constant 0 : i32
    return %c0_i32, %c0_i32_0 : i32, i32
  }
  func.func @transform_7(%arg0: i32) -> (i32, i32) {
    %c0_i32 = arith.constant 0 : i32
    %c0_i32_0 = arith.constant 0 : i32
    %c0_i32_1 = arith.constant 0 : i32
    return %c0_i32, %c0_i32_0 : i32, i32
  }
  func.func @transform_8(%arg0: i32) -> (i32, i32) {
    %c0_i32 = arith.constant 0 : i32
    %c0_i32_0 = arith.constant 0 : i32
    %c0_i32_1 = arith.constant 0 : i32
    return %c0_i32, %c0_i32_0 : i32, i32
  }
  func.func @transform_9(%arg0: i32) -> (i32, i32) {
    %c0_i32 = arith.constant 0 : i32
    %c0_i32_0 = arith.constant 0 : i32
    %c0_i32_1 = arith.constant 0 : i32
    return %c0_i32, %c0_i32_0 : i32, i32
  }
  func.func @transform_10(%arg0: i32) -> (i32, i32, i32) {
    %c0_i32 = arith.constant 0 : i32
    %c0_i32_0 = arith.constant 0 : i32
    %c0_i32_1 = arith.constant 0 : i32
    return %arg0, %c0_i32, %c0_i32_0 : i32, i32, i32
  }
}

</mosaic_0001>

<bundles_post_ra>
// kernel: tpu_custom_call.1
= control target key start
LH: loop header
LB: loop body
LE: loop exit
PB: predicated region body
PF: predicated region fallthrough
CT: control target
= control target key end

     0   :  { %v2221_v1 = vmov 0.0   ;;  %vm2222_vm0 = vmmov 0   ;;  %s2670_s0 = inlined_call_operand.vmem [shape: f32[2,8,128], index: 0, kind: input, shape index: {}]   ;;  %s2671_s1 = inlined_call_operand.vmem [shape: f32[2,8,128], index: 1, kind: input, shape index: {}]   ;;  %s2672_s2 = inlined_call_operand.vmem [shape: f32[2,8,128], index: 2, kind: input, shape index: {}]   ;;  %s2673_s3 = inlined_call_operand.vmem [shape: bf16[128,32], index: 3, kind: input, shape index: {}]   ;;  %s2674_s4 = inlined_call_operand.vmem [shape: bf16[128,32], index: 4, kind: input, shape index: {}]   ;;  %s2675_s5 = inlined_call_operand.vmem [shape: bf16[128,32], index: 5, kind: input, shape index: {}]   ;;  %s2676_s6 = inlined_call_operand.vmem [shape: bf16[32,128], index: 6, kind: input, shape index: {}]   ;;  %s2677_s7 = inlined_call_operand.vmem [shape: bf16[128,128], index: 7, kind: input, shape index: {}]   ;;  %s2678_s8 = inlined_call_operand.vmem [shape: bf16[128,128], index: 8, kind: input, shape index: {}]   ;;  %s2679_s9 = inlined_call_operand.vmem [shape: f32[8,128], index: 9, kind: input, shape index: {}]   ;;  %s2680_s10 = inlined_call_operand.hbm [shape: f32[2,8,128], index: 10, kind: output, shape index: {}]  }
   0x1   :  { %v2115_v0 = vld [vmem:[%s2673_s3] sm:$0xff]   ;;  %1846 = vmatprep.subr.bf16.mxu0 %v2221_v1  ;;  %1866 = vmatprep.subr.bf16.mxu1 %v2221_v1  ;;  %v2117_v3 = vld [vmem:[%s2673_s3 + $0x8] sm:$0xff]   ;;  %v2119_v5 = vld [vmem:[%s2673_s3 + $0x10] sm:$0xff]  }
   0x2   :  { %v2116_v2 = vld [vmem:[%s2674_s4] sm:$0xff]   ;;  %1847 = vmatpush3.bf16.msra.mxu0 %v2115_v0  ;;  %1862 = vmatprep.mubr.msk.bf16.mxu0 %vm2222_vm0, %v2221_v1  ;;  %v2118_v4 = vld [vmem:[%s2674_s4 + $0x8] sm:$0xff]   ;;  %v2120_v6 = vld [vmem:[%s2674_s4 + $0x10] sm:$0xff]  }
   0x3   :  { %1867 = vmatpush3.bf16.msra.mxu1 %v2116_v2  ;;  %1848 = vmatprep.subr.bf16.mxu0 %v2221_v1  ;;  %v2121_v7 = vld [vmem:[%s2673_s3 + $0x18] sm:$0xff]   ;;  %v2123_v9 = vld [vmem:[%s2673_s3 + $0x20] sm:$0xff]   ;;  %v2125_v11 = vld [vmem:[%s2673_s3 + $0x28] sm:$0xff]  }
   0x4   :  { %1868 = vmatprep.subr.bf16.mxu1 %v2221_v1  ;;  %1882 = vmatprep.mubr.msk.bf16.mxu1 %vm2222_vm0, %v2221_v1  ;;  %v2122_v8 = vld [vmem:[%s2674_s4 + $0x18] sm:$0xff]   ;;  %v2124_v10 = vld [vmem:[%s2674_s4 + $0x20] sm:$0xff]   ;;  %v2126_v12 = vld [vmem:[%s2674_s4 + $0x28] sm:$0xff]  }
   0x5   :  { %v2127_v13 = vld [vmem:[%s2673_s3 + $0x30] sm:$0xff]   ;;  %v2129_v15 = vld [vmem:[%s2673_s3 + $0x38] sm:$0xff]   ;;  %v2352_v16 = vld [vmem:[%s2671_s1] sm:$0xff] }
   0x6   :  { %1849 = vmatpush3.bf16.msra.mxu0 %v2117_v3  ;;  %v2128_v14 = vld [vmem:[%s2674_s4 + $0x30] sm:$0xff]   ;;  %v2357_v17 = vld [vmem:[%s2671_s1 + $0x8] sm:$0xff]  ;;  %v2130_v18 = vld [vmem:[%s2674_s4 + $0x38] sm:$0xff]  }
   0x7   :  { %1869 = vmatpush3.bf16.msra.mxu1 %v2118_v4  ;;  %1850 = vmatprep.subr.bf16.mxu0 %v2221_v1  ;;  %v39_v19 = vld [vmem:[%s2670_s0] sm:$0xff]  ;;  %v40_v20 = vld [vmem:[%s2670_s0 + $0x8] sm:$0xff]  ;;  %v43_v21 = vpack.c.bf16 %v2357_v17, %v2352_v16 }
   0x8   :  { %1870 = vmatprep.subr.bf16.mxu1 %v2221_v1  ;;  %v149_v22 = vpack.c.bf16 %v40_v20, %v39_v19 }
   0xa   :  { %1851 = vmatpush3.bf16.msra.mxu0 %v2119_v5 }
   0xb   :  { %1871 = vmatpush3.bf16.msra.mxu1 %v2120_v6  ;;  %1852 = vmatprep.subr.bf16.mxu0 %v2221_v1 }
   0xc   :  { %1872 = vmatprep.subr.bf16.mxu1 %v2221_v1 }
   0xe   :  { %1853 = vmatpush3.bf16.msra.mxu0 %v2121_v7 }
   0xf   :  { %1873 = vmatpush3.bf16.msra.mxu1 %v2122_v8  ;;  %1854 = vmatprep.subr.bf16.mxu0 %v2221_v1 }
  0x10   :  { %1874 = vmatprep.subr.bf16.mxu1 %v2221_v1 }
  0x12   :  { %1855 = vmatpush3.bf16.msra.mxu0 %v2123_v9 }
  0x13   :  { %1875 = vmatpush3.bf16.msra.mxu1 %v2124_v10  ;;  %1856 = vmatprep.subr.bf16.mxu0 %v2221_v1 }
  0x14   :  { %1876 = vmatprep.subr.bf16.mxu1 %v2221_v1 }
  0x16   :  { %1857 = vmatpush3.bf16.msra.mxu0 %v2125_v11 }
  0x17   :  { %1877 = vmatpush3.bf16.msra.mxu1 %v2126_v12  ;;  %1858 = vmatprep.subr.bf16.mxu0 %v2221_v1 }
  0x18   :  { %1878 = vmatprep.subr.bf16.mxu1 %v2221_v1 }
  0x1a   :  { %1859 = vmatpush3.bf16.msra.mxu0 %v2127_v13 }
  0x1b   :  { %1879 = vmatpush3.bf16.msra.mxu1 %v2128_v14  ;;  %1860 = vmatprep.subr.bf16.mxu0 %v2221_v1 }
  0x1c   :  { %1880 = vmatprep.subr.bf16.mxu1 %v2221_v1 }
  0x1e   :  { %1861 = vmatpush3.bf16.msra.mxu0 %v2129_v15 }
  0x1f   :  { %1881 = vmatpush3.bf16.msra.mxu1 %v2130_v18  ;;  %1886 = vmatprep.subr.bf16.mxu0 %v2221_v1 }
  0x20   :  { %1906 = vmatprep.subr.bf16.mxu1 %v2221_v1 }
  0x21   :  { %1863 = vmatmul.mubr.bf16.vlgmr.msra.gmra.mrb[0].mxu0 %v43_v21 }
  0x22   :  { %1883 = vmatmul.mubr.bf16.vlgmr.msra.gmra.mrb[0].mxu1 %v149_v22  ;;  %1902 = vmatprep.mubr.msk.bf16.mxu0 %vm2222_vm0, %v2221_v1 }
  0x23   :  { %15 = vsyncpa [#allocation3], 0  ;;  %1908 = vmatprep.mubr.msk.bf16.mxu1 %vm2222_vm0, %v2221_v1  ;;  %v2131_v23 = vld [vmem:[%s2675_s5] sm:$0xff]   ;;  %v2132_v24 = vld [vmem:[%s2675_s5 + $0x8] sm:$0xff]   ;;  %vm437_vm1 = vcmask 64512   ;;  %s2225_s29 = smov 104  }
  0x24   :  { %1887 = vmatpush3.bf16.msra.mxu0 %v2131_v23  ;;  %v2133_v25 = vld [vmem:[%s2675_s5 + $0x10] sm:$0xff]   ;;  %v2134_v26 = vld [vmem:[%s2675_s5 + $0x18] sm:$0xff]   ;;  %v2135_v27 = vld [vmem:[%s2675_s5 + $0x20] sm:$0xff]   ;;  %vm913_vm2 = vcmask 1043456   ;;  %s2226_s30 = smov 8   ;;  %s2227_s4 = smov 16  }
  0x25   :  { %1888 = vmatprep.subr.bf16.mxu0 %v2221_v1  ;;  %v2136_v28 = vld [vmem:[%s2675_s5 + $0x28] sm:$0xff]   ;;  %v2137_v29 = vld [vmem:[%s2675_s5 + $0x30] sm:$0xff]   ;;  %v2138_v30 = vld [vmem:[%s2675_s5 + $0x38] sm:$0xff]   ;;  %s2223_s5 = smov 120   ;;  %vm1305_vm3 = vcmask 130048   ;;  %vm1308_vm4 = vcmask 195584  }
  0x26   :  { %v41_v31 = vld [vmem:[%s2672_s2] sm:$0xff]  ;;  %v42_v32 = vld [vmem:[%s2672_s2 + $0x8] sm:$0xff]  ;;  %s2224_s2 = smov 112   ;;  %vm1328_vm5 = vcmask 261120  }
  0x27   :  { %v255_v33 = vpack.c.bf16 %v42_v32, %v41_v31 }
  0x28   :  { %1889 = vmatpush3.bf16.msra.mxu0 %v2132_v24 }
  0x29   :  { %1890 = vmatprep.subr.bf16.mxu0 %v2221_v1 }
  0x2c   :  { %1891 = vmatpush3.bf16.msra.mxu0 %v2133_v25 }
  0x2d   :  { %1892 = vmatprep.subr.bf16.mxu0 %v2221_v1 }
  0x30   :  { %1893 = vmatpush3.bf16.msra.mxu0 %v2134_v26 }
  0x31   :  { %1894 = vmatprep.subr.bf16.mxu0 %v2221_v1 }
  0x34   :  { %1895 = vmatpush3.bf16.msra.mxu0 %v2135_v27 }
  0x35   :  { %1896 = vmatprep.subr.bf16.mxu0 %v2221_v1 }
  0x38   :  { %1897 = vmatpush3.bf16.msra.mxu0 %v2136_v28 }
  0x39   :  { %1898 = vmatprep.subr.bf16.mxu0 %v2221_v1 }
  0x3c   :  { %1899 = vmatpush3.bf16.msra.mxu0 %v2137_v29 }
  0x3d   :  { %1900 = vmatprep.subr.bf16.mxu0 %v2221_v1 }
  0x40   :  { %1901 = vmatpush3.bf16.msra.mxu0 %v2138_v30 }
  0x41   :  { %1930 = vmatprep.subr.bf16.mxu0 %v2221_v1 }
  0x43   :  { %1903 = vmatmul.mubr.bf16.vlgmr.msra.gmra.mrb[4].mxu0 %v255_v33 }
  0x44   :  { %1932 = vmatprep.mubr.msk.bf16.mxu0 %vm2222_vm0, %v2221_v1 }
  0xf4   :  { %v142_v34 = vpop.f32.mrb[0].mxu0 }
  0xf5   :  { %v248_v35 = vpop.f32.mrb[0].mxu1  ;;  %v1864_v36 = vpop.f32.mrb[1].mxu0  ;;  %v421_v48 = vpack.c.bf16 %v142_v34, %v142_v34 }
  0xf6   :  { %383 = vrot.lane.b32.xlu0 %v248_v35, %s2223_s5  ;;  %v1884_v37 = vpop.f32.mrb[1].mxu1  ;;  %v145_v38 = vpop.f32.mrb[2].mxu0  ;;  %v429_v39 = vpack.c.bf16 %v248_v35, %v248_v35 }
  0xf7   :  { %v251_v40 = vpop.f32.mrb[2].mxu1  ;;  %365 = vrot.lane.b32.xlu1 %v145_v38, %s2223_s5  ;;  %v1865_v41 = vpop.f32.mrb[3].mxu0  ;;  %v2070_v42 = vpack.i.bf16 %v145_v38, %v142_v34  ;;  %v422_v50 = vpack.c.bf16 %v145_v38, %v145_v38 }
  0xf8   :  { %v1885_v43 = vpop.f32.mrb[3].mxu1  ;;  %v442_v44 = vsel %vm437_vm1, %v429_v39, 0  ;;  %v2060_v45 = vpack.i.bf16 %v251_v40, %v142_v34  ;;  %v2065_v46 = vpack.i.bf16 %v251_v40, %v248_v35  ;;  %v430_v47 = vpack.c.bf16 %v251_v40, %v251_v40 }
  0xf9   :  { %1907 = vmatpush3.bf16.xpose.msra.mxu1 %v442_v44 }
  0xfa   :  { %2061 = vrot.lane.b32.xlu0 %v2060_v45, %s2223_s5  ;;  %1912 = vmatprep.subr.bf16.mxu1 %v2221_v1  ;;  %v488_v49 = vsel %vm437_vm1, %v430_v47, 0 }
  0xfb   :  { %2066 = vrot.lane.b32.xlu1 %v2065_v46, %s2224_s2 }
  0xfe   :  { %2071 = vrot.lane.b32.xlu0 %v2070_v42, %s2224_s2 }
  0xff   :  { %2076 = vrot.lane.b32.xlu1 %v2065_v46, %s2225_s29 }
 0x100   :  { %1909 = vmatmul.mubr.msk.bf16.vlgmr.msra.gmra.mrb[4].mxu1 %vm437_vm1, %v421_v48 }
 0x101   :  { %1913 = vmatpush3.bf16.xpose.msra.mxu1 %v488_v49  ;;  %1914 = vmatprep.mubr.msk.bf16.mxu1 %vm2222_vm0, %v2221_v1 }
 0x102   :  { %2081 = vrot.lane.b32.xlu0 %v2070_v42, %s2225_s29  ;;  %1918 = vmatprep.subr.bf16.mxu1 %v2221_v1 }
 0x108   :  { %1915 = vmatmul.mubr.msk.bf16.vlgmr.msra.gmra.mrb[8].mxu1 %vm437_vm1, %v422_v50 }
 0x109   :  { %1920 = vmatprep.mubr.msk.bf16.mxu1 %vm2222_vm0, %v2221_v1 }
 0x116   :  { %v354_v25 = vpop.f32.mrb[4].mxu0 }
 0x117   :  { %v1904_v26 = vpop.f32.mrb[5].mxu0  ;;  %v902_v39 = vpack.c.bf16 %v354_v25, %v354_v25 }
 0x118   :  { %v357_v27 = vpop.f32.mrb[6].mxu0 }
 0x119   :  { %v1905_v28 = vpop.f32.mrb[7].mxu0  ;;  %v903_v40 = vpack.c.bf16 %v357_v27, %v357_v27  ;;  %v2467_v41 = vpack.i.bf16 %v357_v27, %v354_v25  ;;  %v915_v42 = vsel %vm913_vm2, %v902_v39, 0 }
 0x11b   :  { %v961_v43 = vsel %vm913_vm2, %v903_v40, 0 }
 0x168   :  { %v384_v51 = vpop.permute.xlu0 %383 }
 0x169   :  { %v431_v52 = vpack.c.bf16 %v384_v51, %v384_v51  ;;  %v366_v53 = vpop.permute.xlu1 %365 }
 0x16a   :  { %v424_v10 = vpack.c.bf16 %v366_v53, %v366_v53 }
 0x16b   :  { %v534_v54 = vsel %vm437_vm1, %v431_v52, 0 }
 0x16c   :  { %v2062_v55 = vpop.permute.xlu0 %2061  ;;  %1919 = vmatpush3.bf16.xpose.msra.mxu1 %v534_v54 }
 0x16d   :  { %v2064_v56 = vunpack.i.h.bf16 %v2062_v55  ;;  %v2063_v57 = vunpack.i.l.bf16 %v2062_v55  ;;  %v2067_v58 = vpop.permute.xlu1 %2066  ;;  %1924 = vmatprep.subr.bf16.mxu1 %v2221_v1 }
 0x16e   :  { %v2068_v59 = vunpack.i.l.bf16 %v2067_v58  ;;  %v2069_v4 = vunpack.i.h.bf16 %v2067_v58 }
 0x16f   :  { %v432_v60 = vpack.c.bf16 %v2064_v56, %v2064_v56  ;;  %v423_v62 = vpack.c.bf16 %v2063_v57, %v2063_v57 }
 0x170   :  { %v433_v61 = vpack.c.bf16 %v2068_v59, %v2068_v59  ;;  %v2072_v63 = vpop.permute.xlu0 %2071  ;;  %v434_v8 = vpack.c.bf16 %v2069_v4, %v2069_v4 }
 0x171   :  { %v2077_v0 = vpop.permute.xlu1 %2076  ;;  %v580_v5 = vsel %vm437_vm1, %v432_v60, 0  ;;  %v2073_v6 = vunpack.i.l.bf16 %v2072_v63  ;;  %v2074_v18 = vunpack.i.h.bf16 %v2072_v63 }
 0x172   :  { %v2078_v2 = vunpack.i.l.bf16 %v2077_v0  ;;  %v626_v3 = vsel %vm437_vm1, %v433_v61, 0  ;;  %v2079_v13 = vunpack.i.h.bf16 %v2077_v0  ;;  %v672_v14 = vsel %vm437_vm1, %v434_v8, 0 }
 0x173   :  { %1921 = vmatmul.mubr.msk.bf16.vlgmr.msra.gmra.mrb[12].mxu1 %vm437_vm1, %v423_v62  ;;  %1931 = vmatpush3.bf16.xpose.msra.mxu0 %v626_v3  ;;  %v425_v9 = vpack.c.bf16 %v2073_v6, %v2073_v6  ;;  %v426_v21 = vpack.c.bf16 %v2074_v18, %v2074_v18 }
 0x174   :  { %1925 = vmatpush3.bf16.xpose.msra.mxu1 %v580_v5  ;;  %1926 = vmatprep.mubr.msk.bf16.mxu1 %vm2222_vm0, %v2221_v1  ;;  %v435_v7 = vpack.c.bf16 %v2078_v2, %v2078_v2  ;;  %v2082_v11 = vpop.permute.xlu0 %2081  ;;  %v436_v19 = vpack.c.bf16 %v2079_v13, %v2079_v13 }
 0x175   :  { %1936 = vmatprep.subr.bf16.mxu1 %v2221_v1  ;;  %1942 = vmatprep.subr.bf16.mxu0 %v2221_v1  ;;  %v2083_v15 = vunpack.i.l.bf16 %v2082_v11  ;;  %v2084_v23 = vunpack.i.h.bf16 %v2082_v11 }
 0x176   :  { %v718_v12 = vsel %vm437_vm1, %v435_v7, 0  ;;  %v764_v22 = vsel %vm437_vm1, %v436_v19, 0 }
 0x177   :  { %v427_v20 = vpack.c.bf16 %v2083_v15, %v2083_v15  ;;  %v428_v24 = vpack.c.bf16 %v2084_v23, %v2084_v23 }
 0x17a   :  { %1933 = vmatmul.mubr.msk.bf16.vlgmr.msra.gmra.mrb[8].mxu0 %vm437_vm1, %v425_v9 }
 0x17b   :  { %1927 = vmatmul.mubr.msk.bf16.vlgmr.msra.gmra.mrb[16].mxu1 %vm437_vm1, %v424_v10  ;;  %1943 = vmatpush3.bf16.xpose.msra.mxu0 %v718_v12 }
 0x17c   :  { %1937 = vmatpush3.bf16.xpose.msra.mxu1 %v672_v14  ;;  %1938 = vmatprep.mubr.msk.bf16.mxu1 %vm2222_vm0, %v2221_v1 }
 0x17d   :  { %1944 = vmatprep.mubr.msk.bf16.mxu0 %vm2222_vm0, %v2221_v1  ;;  %1948 = vmatprep.subr.bf16.mxu1 %v2221_v1 }
 0x17e   :  { %1954 = vmatprep.subr.bf16.mxu0 %v2221_v1 }
 0x182   :  { %1945 = vmatmul.mubr.msk.bf16.vlgmr.msra.gmra.mrb[12].mxu0 %vm437_vm1, %v427_v20 }
 0x183   :  { %1939 = vmatmul.mubr.msk.bf16.vlgmr.msra.gmra.mrb[20].mxu1 %vm437_vm1, %v426_v21  ;;  %1956 = vmatprep.mubr.msk.bf16.mxu0 %vm2222_vm0, %v2221_v1 }
 0x184   :  { %1949 = vmatpush3.bf16.xpose.msra.mxu1 %v764_v22  ;;  %1950 = vmatprep.mubr.msk.bf16.mxu1 %vm2222_vm0, %v2221_v1 }
 0x185   :  { %1960 = vmatprep.subr.bf16.mxu1 %v2221_v1  ;;  %1955 = vmatpush3.bf16.msra.mxu0 %v915_v42 }
 0x186   :  { %1966 = vmatprep.subr.bf16.mxu0 %v2221_v1 }
 0x18b   :  { %1951 = vmatmul.mubr.msk.bf16.vlgmr.msra.gmra.mrb[24].mxu1 %vm437_vm1, %v428_v24 }
 0x18c   :  { %1962 = vmatprep.mubr.msk.bf16.mxu1 %vm2222_vm0, %v2221_v1  ;;  %1961 = vmatpush3.bf16.msra.mxu1 %v961_v43 }
 0x18d   :  { %1972 = vmatprep.subr.bf16.mxu1 %v2221_v1 }
 0x1d3   :  { %v478_v29 = vpop.f32.mrb[4].mxu1 }
 0x1d4   :  { %v1910_v30 = vpop.f32.mrb[5].mxu1  ;;  %v806_v31 = vsel %vm437_vm1, %v478_v29, -inf }
 0x1d5   :  { %v481_v32 = vpop.f32.mrb[6].mxu1  ;;  %807 = vmax.xlane.f32.xlu1 %v806_v31 }
 0x1d6   :  { %v1911_v33 = vpop.f32.mrb[7].mxu1 }
 0x1db   :  { %v524_v34 = vpop.f32.mrb[8].mxu1 }
 0x1dc   :  { %v1916_v35 = vpop.f32.mrb[9].mxu1  ;;  %v809_v36 = vsel %vm437_vm1, %v524_v34, -inf }
 0x1dd   :  { %810 = vmax.xlane.f32.xlu0 %v809_v36  ;;  %v527_v37 = vpop.f32.mrb[10].mxu1 }
 0x1de   :  { %v1917_v38 = vpop.f32.mrb[11].mxu1 }
 0x246   :  { %v570_v44 = vpop.f32.mrb[12].mxu1 }
 0x247   :  { %v1922_v45 = vpop.f32.mrb[13].mxu1  ;;  %v812_v46 = vsel %vm437_vm1, %v570_v44, -inf }
 0x248   :  { %813 = vmax.xlane.f32.xlu0 %v812_v46  ;;  %v573_v47 = vpop.f32.mrb[14].mxu1 }
 0x249   :  { %v1923_v48 = vpop.f32.mrb[15].mxu1 }
 0x24d   :  { %v662_v49 = vpop.f32.mrb[8].mxu0 }
 0x24e   :  { %v616_v50 = vpop.f32.mrb[16].mxu1  ;;  %v1934_v51 = vpop.f32.mrb[9].mxu0  ;;  %v818_v52 = vsel %vm437_vm1, %v662_v49, -inf }
 0x24f   :  { %v1928_v53 = vpop.f32.mrb[17].mxu1  ;;  %v815_v54 = vsel %vm437_vm1, %v616_v50, -inf  ;;  %819 = vmax.xlane.f32.xlu0 %v818_v52  ;;  %v665_v55 = vpop.f32.mrb[10].mxu0 }
 0x250   :  { %816 = vmax.xlane.f32.xlu1 %v815_v54  ;;  %v619_v56 = vpop.f32.mrb[18].mxu1  ;;  %v1935_v57 = vpop.f32.mrb[11].mxu0 }
 0x251   :  { %v1929_v58 = vpop.f32.mrb[19].mxu1 }
 0x255   :  { %v754_v59 = vpop.f32.mrb[12].mxu0 }
 0x256   :  { %v2476_v60 = vpop.f32.mrb[20].mxu1  ;;  %v1946_v61 = vpop.f32.mrb[13].mxu0  ;;  %v824_v62 = vsel %vm437_vm1, %v754_v59, -inf }
 0x257   :  { %v1940_v63 = vpop.f32.mrb[21].mxu1  ;;  %v821_v0 = vsel %vm437_vm1, %v2476_v60, -inf  ;;  %825 = vmax.xlane.f32.xlu0 %v824_v62  ;;  %v757_v2 = vpop.f32.mrb[14].mxu0 }
 0x258   :  { %822 = vmax.xlane.f32.xlu1 %v821_v0  ;;  %v711_v3 = vpop.f32.mrb[22].mxu1  ;;  %v1947_v4 = vpop.f32.mrb[15].mxu0 }
 0x259   :  { %v1941_v5 = vpop.f32.mrb[23].mxu1 }
 0x25e   :  { %v2481_v6 = vpop.f32.mrb[24].mxu1 }
 0x25f   :  { %v1952_v7 = vpop.f32.mrb[25].mxu1  ;;  %v827_v8 = vsel %vm437_vm1, %v2481_v6, -inf }
 0x260   :  { %828 = vmax.xlane.f32.xlu1 %v827_v8  ;;  %v803_v9 = vpop.f32.mrb[26].mxu1 }
 0x261   :  { %v1953_v10 = vpop.f32.mrb[27].mxu1 }
 0x262   :  { %v808_v11 = vpop.xlane.xlu1 %807 }
 0x263   :  { %v830_v12 = vsub.f32 %v478_v29, %v808_v11 }
 0x265   :  { %v838_v13 = vmul.f32 1.442695, %v830_v12 }
 0x267   :  { %2157 = vpow2.f32 %v838_v13 }
 0x26a   :  { %v811_v14 = vpop.xlane.xlu0 %810 }
 0x26b   :  { %v831_v15 = vsub.f32 %v524_v34, %v811_v14 }
 0x26d   :  { %v840_v18 = vmul.f32 1.442695, %v831_v15 }
 0x26f   :  { %2159 = vpow2.f32 %v840_v18 }
 0x271   :  { %v2158_v19 = vpop.eup %2157 }
 0x272   :  { %v854_v20 = vsel %vm437_vm1, %v2158_v19, 0.0 }
 0x273   :  { %855 = vadd.xlane.f32.xlu0 %v854_v20 }
 0x279   :  { %v2160_v21 = vpop.eup %2159 }
 0x27a   :  { %v857_v22 = vsel %vm437_vm1, %v2160_v21, 0.0 }
 0x27b   :  { %858 = vadd.xlane.f32.xlu1 %v857_v22 }
 0x2d5   :  { %v814_v23 = vpop.xlane.xlu0 %813 }
 0x2d6   :  { %v832_v24 = vsub.f32 %v570_v44, %v814_v23 }
 0x2d8   :  { %v842_v25 = vmul.f32 1.442695, %v832_v24 }
 0x2da   :  { %2161 = vpow2.f32 %v842_v25 }
 0x2dc   :  { %v820_v26 = vpop.xlane.xlu0 %819 }
 0x2dd   :  { %v817_v27 = vpop.xlane.xlu1 %816  ;;  %v834_v28 = vsub.f32 %v662_v49, %v820_v26 }
 0x2de   :  { %v833_v29 = vsub.f32 %v616_v50, %v817_v27 }
 0x2df   :  { %v846_v30 = vmul.f32 1.442695, %v834_v28 }
 0x2e0   :  { %v844_v31 = vmul.f32 1.442695, %v833_v29 }
 0x2e1   :  { %2163 = vpow2.f32 %v846_v30 }
 0x2e2   :  { %2165 = vpow2.f32 %v844_v31 }
 0x2e4   :  { %v2162_v32 = vpop.eup %2161  ;;  %v826_v33 = vpop.xlane.xlu0 %825 }
 0x2e5   :  { %v836_v34 = vsub.f32 %v754_v59, %v826_v33  ;;  %v860_v35 = vsel %vm437_vm1, %v2162_v32, 0.0  ;;  %v823_v44 = vpop.xlane.xlu1 %822 }
 0x2e6   :  { %861 = vadd.xlane.f32.xlu0 %v860_v35  ;;  %v835_v50 = vsub.f32 %v2476_v60, %v823_v44 }
 0x2e7   :  { %v850_v36 = vmul.f32 1.442695, %v836_v34 }
 0x2e8   :  { %v848_v52 = vmul.f32 1.442695, %v835_v50 }
 0x2e9   :  { %2167 = vpow2.f32 %v850_v36 }
 0x2eb   :  { %v2488_v37 = vpop.eup %2163 }
 0x2ec   :  { %v2166_v38 = vpop.eup %2165  ;;  %v866_v39 = vsel %vm437_vm1, %v2488_v37, 0.0 }
 0x2ed   :  { %v863_v40 = vsel %vm437_vm1, %v2166_v38, 0.0  ;;  %867 = vadd.xlane.f32.xlu0 %v866_v39  ;;  %v829_v46 = vpop.xlane.xlu1 %828 }
 0x2ee   :  { %864 = vadd.xlane.f32.xlu1 %v863_v40  ;;  %v837_v53 = vsub.f32 %v2481_v6, %v829_v46 }
 0x2f0   :  { %v852_v56 = vmul.f32 1.442695, %v837_v53 }
 0x2f3   :  { %v2493_v42 = vpop.eup %2167 }
 0x2f4   :  { %v872_v43 = vsel %vm437_vm1, %v2493_v42, 0.0 }
 0x2f5   :  { %873 = vadd.xlane.f32.xlu0 %v872_v43 }
 0x2ff   :  { %2091 = vrot.lane.b32.xlu1 %v2467_v41, %s2224_s2  ;;  %s2229_s2 = smov [#allocation2]  }
 0x300   :  { %v856_v45 = vpop.xlane.xlu0 %855 }
 0x301   :  { %2169 = vrcp.f32 %v856_v45 }
 0x308   :  { %v859_v47 = vpop.xlane.xlu1 %858 }
 0x309   :  { %2171 = vrcp.f32 %v859_v47 }
 0x30a   :  { %2173 = vpow2.f32 %v848_v52 }
 0x30b   :  { %v2170_v48 = vpop.eup %2169  ;;  %2086 = vrot.lane.b32.xlu0 %v2467_v41, %s2223_s5  ;;  %2175 = vpow2.f32 %v852_v56 }
 0x30c   :  { %v886_v49 = vmul.f32 %v2170_v48, %v2158_v19 }
 0x30e   :  { %v894_v51 = vpack.c.bf16 %v886_v49, %v886_v49 }
 0x310   :  { %1957 = vmatmul.mubr.msk.bf16.vlgmr.msra.gmra.mrb[16].mxu0 %vm437_vm1, %v894_v51 }
 0x311   :  { %1968 = vmatprep.mubr.msk.bf16.mxu0 %vm2222_vm0, %v2221_v1 }
 0x313   :  { %v2172_v54 = vpop.eup %2171 }
 0x314   :  { %v887_v55 = vmul.f32 %v2172_v54, %v2160_v21  ;;  %v2509_v58 = vpop.eup %2173 }
 0x315   :  { %v869_v59 = vsel %vm437_vm1, %v2509_v58, 0.0  ;;  %v2513_v60 = vpop.eup %2175 }
 0x316   :  { %v895_v57 = vpack.c.bf16 %v887_v55, %v887_v55  ;;  %v875_v61 = vsel %vm437_vm1, %v2513_v60, 0.0 }
 0x318   :  { %1963 = vmatmul.mubr.msk.bf16.vlgmr.msra.gmra.mrb[28].mxu1 %vm437_vm1, %v895_v57 }
 0x319   :  { %1974 = vmatprep.mubr.msk.bf16.mxu1 %vm2222_vm0, %v2221_v1 }
 0x323   :  { %870 = vadd.xlane.f32.xlu1 %v869_v59 }
 0x327   :  { %876 = vadd.xlane.f32.xlu1 %v875_v61 }
 0x338   :  { %2096 = vrot.lane.b32.xlu1 %v2467_v41, %s2225_s29  ;;  %s1689_s29 = sshll.u32 %s2229_s2, 4  ;;  %s1690_s29 = int_to_ptr.vmem [resolvable:$true] %s1689_s29 }
 0x339   :  { %s2197_s11 = scalar_lea.vmem %s1690_s29, 256  ;;  %p2202_p1 = scmp.lt.s32.totalorder %s1690_s29, %s1690_s29 }
 0x33a   :  { %p2198_p0 = scmp.ne.s32.totalorder %s1690_s29, %s2197_s11  ;;  %p2203_p2 = scmp.lt.s32.totalorder %s2197_s11, %s2197_s11 }
 0x33c   :  { %p2204_p3 = por %p2203_p2, %p2202_p1 }
 0x33e   :  { %p2205_p4 = pnand %p2204_p3, %p2198_p0 }
 0x373   :  { %v862_v62 = vpop.xlane.xlu0 %861 }
 0x374   :  { %2177 = vrcp.f32 %v862_v62 }
 0x37a   :  { %v868_v0 = vpop.xlane.xlu0 %867 }
 0x37b   :  { %v865_v63 = vpop.xlane.xlu1 %864 }
 0x37c   :  { %2179 = vrcp.f32 %v865_v63 }
 0x37d   :  { %2181 = vrcp.f32 %v868_v0 }
 0x37e   :  { %v2178_v4 = vpop.eup %2177 }
 0x37f   :  { %v2092_v3 = vpop.permute.xlu1 %2091  ;;  %v888_v11 = vmul.f32 %v2178_v4, %v2162_v32  ;;  %v2139_v4 = vld [vmem:[%s2676_s6] sm:$0xff]  }
 0x380   :  { %v2094_v7 = vunpack.i.h.bf16 %v2092_v3  ;;  %v2093_v8 = vunpack.i.l.bf16 %v2092_v3 }
 0x381   :  { %v896_v20 = vpack.c.bf16 %v888_v11, %v888_v11 }
 0x382   :  { %v874_v2 = vpop.xlane.xlu0 %873  ;;  %v907_v41 = vpack.c.bf16 %v2094_v7, %v2094_v7  ;;  %v906_v15 = vpack.c.bf16 %v2093_v8, %v2093_v8 }
 0x383   :  { %2183 = vrcp.f32 %v874_v2 }
 0x384   :  { %v1099_v23 = vsel %vm913_vm2, %v906_v15, 0  ;;  %v1145_v24 = vsel %vm913_vm2, %v907_v41, 0 }
 0x386   :  { %v2180_v5 = vpop.eup %2179  ;;  %v2087_v6 = vpop.permute.xlu0 %2086 }
 0x387   :  { %v2089_v9 = vunpack.i.h.bf16 %v2087_v6  ;;  %v2088_v10 = vunpack.i.l.bf16 %v2087_v6  ;;  %v889_v12 = vmul.f32 %v2180_v5, %v2166_v38  ;;  %v2182_v22 = vpop.eup %2181  ;;  %v2140_v5 = vld [vmem:[%s2676_s6 + $0x8] sm:$0xff]   ;;  %s2228_s6 = smov 24  }
 0x388   :  { %v890_v25 = vmul.f32 %v2182_v22, %v2488_v37 }
 0x389   :  { %v905_v13 = vpack.c.bf16 %v2089_v9, %v2089_v9  ;;  %v904_v14 = vpack.c.bf16 %v2088_v10, %v2088_v10  ;;  %v897_v21 = vpack.c.bf16 %v889_v12, %v889_v12 }
 0x38a   :  { %v898_v26 = vpack.c.bf16 %v890_v25, %v890_v25 }
 0x38b   :  { %v1007_v18 = vsel %vm913_vm2, %v904_v14, 0  ;;  %v1053_v19 = vsel %vm913_vm2, %v905_v13, 0 }
 0x38c   :  { %1967 = vmatpush3.bf16.msra.mxu0 %v1007_v18  ;;  %1973 = vmatpush3.bf16.msra.mxu1 %v1053_v19 }
 0x38d   :  { %1978 = vmatprep.subr.bf16.mxu0 %v2221_v1  ;;  %1984 = vmatprep.subr.bf16.mxu1 %v2221_v1  ;;  %v2184_v29 = vpop.eup %2183 }
 0x38e   :  { %v892_v34 = vmul.f32 %v2184_v29, %v2493_v42 }
 0x38f   :  { %1969 = vmatmul.mubr.msk.bf16.vlgmr.msra.gmra.mrb[20].mxu0 %vm437_vm1, %v896_v20  ;;  %1975 = vmatmul.mubr.msk.bf16.vlgmr.msra.gmra.mrb[32].mxu1 %vm437_vm1, %v897_v21 }
 0x390   :  { %1979 = vmatpush3.bf16.msra.mxu0 %v1099_v23  ;;  %1985 = vmatpush3.bf16.msra.mxu1 %v1145_v24  ;;  %v900_v43 = vpack.c.bf16 %v892_v34, %v892_v34 }
 0x391   :  { %1980 = vmatprep.mubr.msk.bf16.mxu0 %vm2222_vm0, %v2221_v1  ;;  %1990 = vmatprep.subr.bf16.mxu0 %v2221_v1 }
 0x392   :  { %1986 = vmatprep.mubr.msk.bf16.mxu1 %vm2222_vm0, %v2221_v1  ;;  %1996 = vmatprep.subr.bf16.mxu1 %v2221_v1 }
 0x397   :  { %1981 = vmatmul.mubr.msk.bf16.vlgmr.msra.gmra.mrb[24].mxu0 %vm437_vm1, %v898_v26 }
 0x398   :  { %1992 = vmatprep.mubr.msk.bf16.mxu0 %vm2222_vm0, %v2221_v1 }
 0x3b0   :  { %v871_v27 = vpop.xlane.xlu1 %870 }
 0x3b1   :  { %2185 = vrcp.f32 %v871_v27 }
 0x3b4   :  { %v877_v28 = vpop.xlane.xlu1 %876 }
 0x3b5   :  { %2187 = vrcp.f32 %v877_v28 }
 0x3b8   :  { %v2097_v30 = vpop.permute.xlu1 %2096 }
 0x3b9   :  { %v2099_v31 = vunpack.i.h.bf16 %v2097_v30  ;;  %v2098_v32 = vunpack.i.l.bf16 %v2097_v30 }
 0x3bb   :  { %v2186_v33 = vpop.eup %2185  ;;  %v908_v35 = vpack.c.bf16 %v2098_v32, %v2098_v32  ;;  %v909_v37 = vpack.c.bf16 %v2099_v31, %v2099_v31 }
 0x3bc   :  { %v891_v36 = vmul.f32 %v2186_v33, %v2509_v58 }
 0x3bd   :  { %v1191_v38 = vsel %vm913_vm2, %v908_v35, 0  ;;  %v1237_v44 = vsel %vm913_vm2, %v909_v37, 0 }
 0x3be   :  { %1991 = vmatpush3.bf16.msra.mxu0 %v1191_v38  ;;  %v899_v39 = vpack.c.bf16 %v891_v36, %v891_v36 }
 0x3bf   :  { %v2188_v40 = vpop.eup %2187  ;;  %2002 = vmatprep.subr.bf16.mxu0 %v2221_v1 }
 0x3c0   :  { %1987 = vmatmul.mubr.msk.bf16.vlgmr.msra.gmra.mrb[36].mxu1 %vm437_vm1, %v899_v39  ;;  %v893_v42 = vmul.f32 %v2188_v40, %v2513_v60 }
 0x3c1   :  { %1997 = vmatpush3.bf16.msra.mxu1 %v1237_v44  ;;  %1993 = vmatmul.mubr.msk.bf16.vlgmr.msra.gmra.mrb[28].mxu0 %vm437_vm1, %v900_v43 }
 0x3c2   :  { %1998 = vmatprep.mubr.msk.bf16.mxu1 %vm2222_vm0, %v2221_v1  ;;  %2006 = vmatprep.mubr.msk.bf16.mxu0 %vm2222_vm0, %v2221_v1  ;;  %v901_v45 = vpack.c.bf16 %v893_v42, %v893_v42  ;;  %v2141_v42 = vld [vmem:[%s2677_s7] sm:$0xff]  }
 0x3c3   :  { %2010 = vmatprep.subr.bf16.mxu1 %v2221_v1  ;;  %2003 = vmatpush3.bf16.msra.mxu0 %v2139_v4 }
 0x3c4   :  { %2004 = vmatprep.subr.bf16.mxu0 %v2221_v1 }
 0x3c7   :  { %2005 = vmatpush3.bf16.msra.mxu0 %v2140_v5 }
 0x3c8   :  { %1999 = vmatmul.mubr.msk.bf16.vlgmr.msra.gmra.mrb[40].mxu1 %vm437_vm1, %v901_v45  ;;  %2030 = vmatprep.subr.bf16.mxu0 %v2221_v1  ;;  %v2142_v45 = vld [vmem:[%s2677_s7 + $0x8] sm:$0xff]  }
 0x3c9   :  { %2026 = vmatprep.mubr.msk.bf16.mxu1 %vm2222_vm0, %v2221_v1  ;;  %2011 = vmatpush3.bf16.msra.mxu1 %v2141_v42 }
 0x3ca   :  { %2012 = vmatprep.subr.bf16.mxu1 %v2221_v1 }
 0x3cd   :  { %2013 = vmatpush3.bf16.msra.mxu1 %v2142_v45 }
 0x3ce   :  { %2014 = vmatprep.subr.bf16.mxu1 %v2221_v1 }
 0x3e3   :  { %v951_v46 = vpop.f32.mrb[16].mxu0 }
 0x3e4   :  { %v1958_v47 = vpop.f32.mrb[17].mxu0 }
 0x3e5   :  { %v954_v48 = vpop.f32.mrb[18].mxu0  ;;  %v2579_v47 = vld [vmem:[%s2679_s9 + $0x6] ss:$0 sm:$0xff] }
 0x3e6   :  { %v1959_v49 = vpop.f32.mrb[19].mxu0 }
 0x3eb   :  { %v997_v50 = vpop.f32.mrb[28].mxu1 }
 0x3ec   :  { %v1964_v51 = vpop.f32.mrb[29].mxu1 }
 0x3ed   :  { %v1000_v52 = vpop.f32.mrb[30].mxu1 }
 0x3ee   :  { %v1965_v53 = vpop.f32.mrb[31].mxu1 }
 0x462   :  { %v1043_v54 = vpop.f32.mrb[20].mxu0  ;;  %v1089_v55 = vpop.f32.mrb[32].mxu1 }
 0x463   :  { %v2100_v56 = vpack.i.bf16 %v1089_v55, %v1043_v54  ;;  %v1970_v57 = vpop.f32.mrb[21].mxu0  ;;  %v1976_v58 = vpop.f32.mrb[33].mxu1  ;;  %v2143_v55 = vld [vmem:[%s2677_s7 + $0x10] sm:$0xff]  }
 0x464   :  { %v1046_v59 = vpop.f32.mrb[22].mxu0  ;;  %v1092_v60 = vpop.f32.mrb[34].mxu1  ;;  %2015 = vmatpush3.bf16.msra.mxu1 %v2143_v55  ;;  %v2145_v57 = vld [vmem:[%s2677_s7 + $0x20] sm:$0xff]   ;;  %v2146_v58 = vld [vmem:[%s2677_s7 + $0x28] sm:$0xff]  }
 0x465   :  { %v1977_v61 = vpop.f32.mrb[35].mxu1  ;;  %2101 = vrot.lane.b32.xlu0 %v2100_v56, %s2226_s30  ;;  %v1971_v62 = vpop.f32.mrb[23].mxu0  ;;  %2016 = vmatprep.subr.bf16.mxu1 %v2221_v1  ;;  %v2144_v56 = vld [vmem:[%s2677_s7 + $0x18] sm:$0xff]   ;;  %v2147_v59 = vld [vmem:[%s2677_s7 + $0x30] sm:$0xff]  }
 0x466   :  { %v2148_v60 = vld [vmem:[%s2677_s7 + $0x38] sm:$0xff]   ;;  %v2149_v61 = vld [vmem:[%s2678_s8] sm:$0xff]   ;;  %v2150_v62 = vld [vmem:[%s2678_s8 + $0x8] sm:$0xff]  }
 0x468   :  { %2017 = vmatpush3.bf16.msra.mxu1 %v2144_v56 }
 0x469   :  { %2018 = vmatprep.subr.bf16.mxu1 %v2221_v1 }
 0x46a   :  { %v1135_v63 = vpop.f32.mrb[24].mxu0 }
 0x46b   :  { %v1982_v0 = vpop.f32.mrb[25].mxu0 }
 0x46c   :  { %v1138_v2 = vpop.f32.mrb[26].mxu0  ;;  %2019 = vmatpush3.bf16.msra.mxu1 %v2145_v57  ;;  %v2152_v0 = vld [vmem:[%s2678_s8 + $0x18] sm:$0xff]  }
 0x46d   :  { %v1983_v3 = vpop.f32.mrb[27].mxu0  ;;  %2020 = vmatprep.subr.bf16.mxu1 %v2221_v1  ;;  %v2153_v2 = vld [vmem:[%s2678_s8 + $0x20] sm:$0xff]  }
 0x46e   :  { %v2154_v3 = vld [vmem:[%s2678_s8 + $0x28] sm:$0xff]  }
 0x470   :  { %2021 = vmatpush3.bf16.msra.mxu1 %v2146_v58 }
 0x471   :  { %2022 = vmatprep.subr.bf16.mxu1 %v2221_v1 }
 0x474   :  { %2023 = vmatpush3.bf16.msra.mxu1 %v2147_v59  ;;  %v1764_v59 = vld [vmem:[%s2679_s9 + $0x2] ss:$0 sm:$0xff] }
 0x475   :  { %2024 = vmatprep.subr.bf16.mxu1 %v2221_v1 }
 0x478   :  { %2025 = vmatpush3.bf16.msra.mxu1 %v2148_v60 }
 0x493   :  { %v1181_v6 = vpop.f32.mrb[36].mxu1 }
 0x494   :  { %v2105_v7 = vpack.i.bf16 %v1181_v6, %v1135_v63  ;;  %v1988_v8 = vpop.f32.mrb[37].mxu1  ;;  %v1227_v9 = vpop.f32.mrb[28].mxu0  ;;  %v2151_v63 = vld [vmem:[%s2678_s8 + $0x10] sm:$0xff]  }
 0x495   :  { %v1184_v10 = vpop.f32.mrb[38].mxu1  ;;  %v1994_v11 = vpop.f32.mrb[29].mxu0 }
 0x496   :  { %v1989_v12 = vpop.f32.mrb[39].mxu1  ;;  %2106 = vrot.lane.b32.xlu1 %v2105_v7, %s2227_s4  ;;  %v1230_v13 = vpop.f32.mrb[30].mxu0  ;;  %v1744_v11 = vld [vmem:[%s2679_s9] ss:$0 sm:$0xff] }
 0x497   :  { %v1995_v14 = vpop.f32.mrb[31].mxu0 }
 0x49b   :  { %v1273_v41 = vpop.f32.mrb[40].mxu1 }
 0x49c   :  { %v2110_v15 = vpack.i.bf16 %v1273_v41, %v1227_v9  ;;  %v2000_v18 = vpop.f32.mrb[41].mxu1 }
 0x49d   :  { %v1276_v19 = vpop.f32.mrb[42].mxu1 }
 0x49e   :  { %v2001_v20 = vpop.f32.mrb[43].mxu1  ;;  %2111 = vrot.lane.b32.xlu0 %v2110_v15, %s2228_s6  ;;  %v1745_v15 = vld [vmem:[%s2679_s9 + $0x1] ss:$0 sm:$0xff] }
 0x4d7   :  { %v2102_v21 = vpop.permute.xlu0 %2101 }
 0x4d8   :  { %v2104_v23 = vunpack.i.h.bf16 %v2102_v21  ;;  %v2103_v24 = vunpack.i.l.bf16 %v2102_v21 }
 0x4da   :  { %v1304_v28 = vsel %vm437_vm1, %v997_v50, %v2104_v23  ;;  %v1303_v29 = vsel %vm437_vm1, %v951_v46, %v2103_v24  ;;  %v2156_v23 = vld [vmem:[%s2678_s8 + $0x38] sm:$0xff]   ;;  %v1746_v24 = vld [vmem:[%s2679_s9 + $0x5] ss:$0 sm:$0xff] }
 0x508   :  { %v2107_v22 = vpop.permute.xlu1 %2106 }
 0x509   :  { %v2109_v25 = vunpack.i.h.bf16 %v2107_v22  ;;  %v2108_v26 = vunpack.i.l.bf16 %v2107_v22  ;;  %v2155_v22 = vld [vmem:[%s2678_s8 + $0x30] sm:$0xff]  }
 0x50b   :  { %v1307_v32 = vsel %vm1305_vm3, %v1304_v28, %v2109_v25  ;;  %v1306_v33 = vsel %vm1305_vm3, %v1303_v29, %v2108_v26 }
 0x510   :  { %v2112_v27 = vpop.permute.xlu0 %2111 }
 0x511   :  { %v2114_v30 = vunpack.i.h.bf16 %v2112_v27  ;;  %v2113_v31 = vunpack.i.l.bf16 %v2112_v27 }
 0x513   :  { %v1310_v34 = vsel %vm1308_vm4, %v1307_v32, %v2114_v30  ;;  %v1309_v35 = vsel %vm1308_vm4, %v1306_v33, %v2113_v31 }
 0x514   :  { %v1311_v36 = vpack.c.bf16 %v1310_v34, %v1309_v35 }
 0x516   :  { %2007 = vmatmul.mubr.msk.bf16.vlgmr.msra.gmra.mrb[32].mxu0 %vm1328_vm5, %v1311_v36 }
 0x517   :  { %2046 = vmatprep.mubr.msk.bf16.mxu0 %vm2222_vm0, %v2221_v1  ;;  %2031 = vmatpush3.bf16.msra.mxu0 %v2149_v61 }
 0x518   :  { %2032 = vmatprep.subr.bf16.mxu0 %v2221_v1 }
 0x51b   :  { %2033 = vmatpush3.bf16.msra.mxu0 %v2150_v62 }
 0x51c   :  { %2034 = vmatprep.subr.bf16.mxu0 %v2221_v1 }
 0x51f   :  { %2035 = vmatpush3.bf16.msra.mxu0 %v2151_v63 }
 0x520   :  { %2036 = vmatprep.subr.bf16.mxu0 %v2221_v1 }
 0x523   :  { %2037 = vmatpush3.bf16.msra.mxu0 %v2152_v0 }
 0x524   :  { %2038 = vmatprep.subr.bf16.mxu0 %v2221_v1 }
 0x527   :  { %2039 = vmatpush3.bf16.msra.mxu0 %v2153_v2 }
 0x528   :  { %2040 = vmatprep.subr.bf16.mxu0 %v2221_v1 }
 0x52b   :  { %2041 = vmatpush3.bf16.msra.mxu0 %v2154_v3 }
 0x52c   :  { %2042 = vmatprep.subr.bf16.mxu0 %v2221_v1 }
 0x52f   :  { %2043 = vmatpush3.bf16.msra.mxu0 %v2155_v22 }
 0x530   :  { %2044 = vmatprep.subr.bf16.mxu0 %v2221_v1  ;;  %v1755_v1 = vld [vmem:[%s2679_s9 + $0x4] ss:$0 sm:$0xff] }
 0x533   :  { %2045 = vmatpush3.bf16.msra.mxu0 %v2156_v23 }
 0x5e9   :  { %v1366_v37 = vpop.f32.mrb[32].mxu0 }
 0x5ea   :  { %v1380_v38 = vadd.f32 %v1366_v37, %v2352_v16  ;;  %v2008_v39 = vpop.f32.mrb[33].mxu0 }
 0x5eb   :  { %v1369_v40 = vpop.f32.mrb[34].mxu0 }
 0x5ec   :  { %v1381_v43 = vadd.f32 %v1369_v40, %v2357_v17  ;;  %1382 = vadd.xlane.f32.xlu1 %v1380_v38  ;;  %v2009_v44 = vpop.f32.mrb[35].mxu0 }
 0x5ee   :  { %1384 = vadd.xlane.f32.xlu0 %v1381_v43 }
 0x679   :  { %v1383_v16 = vpop.xlane.xlu1 %1382 }
 0x67a   :  { %v1386_v46 = vmul.f32 0.03125, %v1383_v16 }
 0x67b   :  { %v1385_v17 = vpop.xlane.xlu0 %1384 }
 0x67c   :  { %v1388_v48 = vsub.f32 %v1380_v38, %v1386_v46  ;;  %v1387_v49 = vmul.f32 0.03125, %v1385_v17 }
 0x67e   :  { %v1389_v50 = vsub.f32 %v1381_v43, %v1387_v49  ;;  %v1394_v51 = vmul.f32 %v2579_v47, %v1388_v48 }
 0x680   :  { %v1396_v52 = vmul.f32 %v1394_v51, %v1394_v51  ;;  %v1395_v53 = vmul.f32 %v2579_v47, %v1389_v50 }
 0x682   :  { %1398 = vadd.xlane.f32.xlu0 %v1396_v52  ;;  %v1397_v54 = vmul.f32 %v1395_v53, %v1395_v53 }
 0x684   :  { %1400 = vadd.xlane.f32.xlu1 %v1397_v54 }
 0x70f   :  { %v1399_v4 = vpop.xlane.xlu0 %1398 }
 0x710   :  { %v1402_v5 = vmul.f32 0.03125, %v1399_v4 }
 0x711   :  { %v1401_v6 = vpop.xlane.xlu1 %1400 }
 0x712   :  { %v1404_v7 = vadd.f32 1e-05, %v1402_v5  ;;  %v1403_v8 = vmul.f32 0.03125, %v1401_v6 }
 0x714   :  { %2189 = vrsqrt.f32 %v1404_v7  ;;  %v1405_v9 = vadd.f32 1e-05, %v1403_v8 }
 0x716   :  { %2191 = vrsqrt.f32 %v1405_v9 }
 0x71e   :  { %v2190_v10 = vpop.eup %2189 }
 0x71f   :  { %v1408_v12 = vmul.f32 %v2190_v10, %v1394_v51 }
 0x720   :  { %v2192_v13 = vpop.eup %2191 }
 0x721   :  { %v1409_v14 = vmul.f32 %v2192_v13, %v1395_v53  ;;  %v1414_v41 = vmul.f32 %v1744_v11, %v1408_v12 }
 0x723   :  { %v1415_v18 = vmul.f32 %v1744_v11, %v1409_v14  ;;  %v1420_v19 = vadd.f32 %v1745_v15, %v1414_v41 }
 0x725   :  { %v1421_v20 = vadd.f32 %v1745_v15, %v1415_v18 }
 0x727   :  { %v1422_v21 = vpack.c.bf16 %v1421_v20, %v1420_v19 }
 0x729   :  { %2027 = vmatmul.mubr.bf16.vlgmr.msra.gmra.mrb[44].mxu1 %v1422_v21 }
 0x7fc   :  { %v1525_v25 = vpop.f32.mrb[44].mxu1 }
 0x7fd   :  { %v1526_v26 = vadd.f32 %v1746_v24, %v1525_v25  ;;  %v2028_v27 = vpop.f32.mrb[45].mxu1 }
 0x7fe   :  { %v1528_v28 = vpop.f32.mrb[46].mxu1 }
 0x7ff   :  { %v1529_v29 = vadd.f32 %v1746_v24, %v1528_v28  ;;  %v2029_v30 = vpop.f32.mrb[47].mxu1  ;;  %v1532_v31 = vmax.f32 %v1526_v26, 0.0 }
 0x801   :  { %v1533_v32 = vmax.f32 %v1529_v29, 0.0 }
 0x803   :  { %v1534_v33 = vpack.c.bf16 %v1533_v32, %v1532_v31 }
 0x805   :  { %2047 = vmatmul.mubr.bf16.vlgmr.msra.gmra.mrb[36].mxu0 %v1534_v33 }
 0x8d8   :  { %v1637_v34 = vpop.f32.mrb[36].mxu0 }
 0x8d9   :  { %v1638_v35 = vadd.f32 %v1755_v1, %v1637_v34  ;;  %v2048_v36 = vpop.f32.mrb[37].mxu0 }
 0x8da   :  { %v1640_v37 = vpop.f32.mrb[38].mxu0 }
 0x8db   :  { %v1641_v38 = vadd.f32 %v1755_v1, %v1640_v37  ;;  %v2049_v39 = vpop.f32.mrb[39].mxu0  ;;  %v1644_v40 = vadd.f32 %v1638_v35, %v1420_v19 }
 0x8dd   :  { %1646 = vadd.xlane.f32.xlu0 %v1644_v40  ;;  %v1645_v43 = vadd.f32 %v1641_v38, %v1421_v20 }
 0x8df   :  { %1648 = vadd.xlane.f32.xlu1 %v1645_v43 }
 0x96a   :  { %v1647_v44 = vpop.xlane.xlu0 %1646 }
 0x96b   :  { %v1650_v42 = vmul.f32 0.03125, %v1647_v44 }
 0x96c   :  { %v1649_v45 = vpop.xlane.xlu1 %1648 }
 0x96d   :  { %v1652_v16 = vsub.f32 %v1644_v40, %v1650_v42  ;;  %v1651_v46 = vmul.f32 0.03125, %v1649_v45 }
 0x96f   :  { %v1653_v17 = vsub.f32 %v1645_v43, %v1651_v46  ;;  %v1654_v48 = vmul.f32 %v2579_v47, %v1652_v16 }
 0x971   :  { %v1656_v49 = vmul.f32 %v1654_v48, %v1654_v48  ;;  %v1655_v50 = vmul.f32 %v2579_v47, %v1653_v17  ;;  %v1765_v47 = vld [vmem:[%s2679_s9 + $0x3] ss:$0 sm:$0xff] }
 0x973   :  { %1658 = vadd.xlane.f32.xlu0 %v1656_v49  ;;  %v1657_v51 = vmul.f32 %v1655_v50, %v1655_v50 }
 0x975   :  { %1660 = vadd.xlane.f32.xlu1 %v1657_v51 }
 0xa00   :  { %v1659_v52 = vpop.xlane.xlu0 %1658 }
 0xa01   :  { %v1662_v53 = vmul.f32 0.03125, %v1659_v52 }
 0xa02   :  { %v1661_v54 = vpop.xlane.xlu1 %1660 }
 0xa03   :  { %v1664_v55 = vadd.f32 1e-05, %v1662_v53  ;;  %v1663_v56 = vmul.f32 0.03125, %v1661_v54 }
 0xa05   :  { %2193 = vrsqrt.f32 %v1664_v55  ;;  %v1665_v57 = vadd.f32 1e-05, %v1663_v56 }
 0xa07   :  { %2195 = vrsqrt.f32 %v1665_v57 }
 0xa0f   :  { %v2194_v58 = vpop.eup %2193 }
 0xa10   :  { %v1668_v60 = vmul.f32 %v2194_v58, %v1654_v48 }
 0xa11   :  { %v2196_v61 = vpop.eup %2195 }
 0xa12   :  { %v1669_v62 = vmul.f32 %v2196_v61, %v1655_v50  ;;  %v1674_v63 = vmul.f32 %v1764_v59, %v1668_v60 }
 0xa14   :  { %v1675_v0 = vmul.f32 %v1764_v59, %v1669_v62  ;;  %v1680_v2 = vadd.f32 %v1765_v47, %v1674_v63 }
 0xa16   :  { %v1681_v3 = vadd.f32 %v1765_v47, %v1675_v0  ;;  %1682 = vst [vmem:[#allocation2] sm:$0xff] %v1680_v2 }
 0xa18   :  { %1683 = vst [vmem:[#allocation2 + $0x8] sm:$0xff] %v1681_v3 }
 0xa19   :  { %2208 = shalt.err (!%p2205_p4)
}
 0xa1a   :  { %s2209_s9 = scalar_lea.hbm %s2680_s10, 256 }
 0xa1b   :  { %p2210_p5 = scmp.ne.s32.totalorder %s2680_s10, %s2209_s9  ;;  %p2213_p6 = scmp.lt.u32.totalorder %s2209_s9, %s2680_s10 }
 0xa1d   :  { %p2215_p7 = pnand %p2213_p6, %p2210_p5 }
 0xa1f   :  { %2218 = shalt.err (!%p2215_p7)
}
 0xa20   :  { %s2230_s12 = smov 128  }
 0xa21   :  { %1695 = dma.vmem_to_hbm [thread:$0]  %s1690_s29, 256, %s2680_s10, [#allocation3], %s2230_s12, %s2230_s12, %s2226_s30  }
 0xa22   :  { %2219 = dma.done.wait [#allocation3], 256  }
 0xa23   :  { %2220 = vsyncadd [#allocation3], 4294967040 }
 0xa24   :  { %1699 = vsyncpa [#allocation3], 1 }

// kernel: tpu_custom_call.1
= control target key start
LH: loop header
LB: loop body
LE: loop exit
PB: predicated region body
PF: predicated region fallthrough
CT: control target
= control target key end

     0   :  { %v2221_v1 = vmov 0.0   ;;  %vm2222_vm0 = vmmov 0   ;;  %s2670_s0 = inlined_call_operand.vmem [shape: f32[2,8,128], index: 0, kind: input, shape index: {}]   ;;  %s2671_s1 = inlined_call_operand.vmem [shape: f32[2,8,128], index: 1, kind: input, shape index: {}]   ;;  %s2672_s2 = inlined_call_operand.vmem [shape: f32[2,8,128], index: 2, kind: input, shape index: {}]   ;;  %s2673_s3 = inlined_call_operand.vmem [shape: bf16[128,32], index: 3, kind: input, shape index: {}]   ;;  %s2674_s4 = inlined_call_operand.vmem [shape: bf16[128,32], index: 4, kind: input, shape index: {}]   ;;  %s2675_s5 = inlined_call_operand.vmem [shape: bf16[128,32], index: 5, kind: input, shape index: {}]   ;;  %s2676_s6 = inlined_call_operand.vmem [shape: bf16[32,128], index: 6, kind: input, shape index: {}]   ;;  %s2677_s7 = inlined_call_operand.vmem [shape: bf16[128,128], index: 7, kind: input, shape index: {}]   ;;  %s2678_s8 = inlined_call_operand.vmem [shape: bf16[128,128], index: 8, kind: input, shape index: {}]   ;;  %s2679_s9 = inlined_call_operand.vmem [shape: f32[8,128], index: 9, kind: input, shape index: {}]   ;;  %s2680_s10 = inlined_call_operand.hbm [shape: f32[2,8,128], index: 10, kind: output, shape index: {}]  }
   0x1   :  { %v2115_v0 = vld [vmem:[%s2673_s3] sm:$0xff]   ;;  %1846 = vmatprep.subr.bf16.mxu0 %v2221_v1  ;;  %1866 = vmatprep.subr.bf16.mxu1 %v2221_v1  ;;  %v2117_v3 = vld [vmem:[%s2673_s3 + $0x8] sm:$0xff]   ;;  %v2119_v5 = vld [vmem:[%s2673_s3 + $0x10] sm:$0xff]  }
   0x2   :  { %v2116_v2 = vld [vmem:[%s2674_s4] sm:$0xff]   ;;  %1847 = vmatpush3.bf16.msra.mxu0 %v2115_v0  ;;  %1862 = vmatprep.mubr.msk.bf16.mxu0 %vm2222_vm0, %v2221_v1  ;;  %v2118_v4 = vld [vmem:[%s2674_s4 + $0x8] sm:$0xff]   ;;  %v2120_v6 = vld [vmem:[%s2674_s4 + $0x10] sm:$0xff]  }
   0x3   :  { %1867 = vmatpush3.bf16.msra.mxu1 %v2116_v2  ;;  %1848 = vmatprep.subr.bf16.mxu0 %v2221_v1  ;;  %v2121_v7 = vld [vmem:[%s2673_s3 + $0x18] sm:$0xff]   ;;  %v2123_v9 = vld [vmem:[%s2673_s3 + $0x20] sm:$0xff]   ;;  %v2125_v11 = vld [vmem:[%s2673_s3 + $0x28] sm:$0xff]  }
   0x4   :  { %1868 = vmatprep.subr.bf16.mxu1 %v2221_v1  ;;  %1882 = vmatprep.mubr.msk.bf16.mxu1 %vm2222_vm0, %v2221_v1  ;;  %v2122_v8 = vld [vmem:[%s2674_s4 + $0x18] sm:$0xff]   ;;  %v2124_v10 = vld [vmem:[%s2674_s4 + $0x20] sm:$0xff]   ;;  %v2126_v12 = vld [vmem:[%s2674_s4 + $0x28] sm:$0xff]  }
   0x5   :  { %v2127_v13 = vld [vmem:[%s2673_s3 + $0x30] sm:$0xff]   ;;  %v2129_v15 = vld [vmem:[%s2673_s3 + $0x38] sm:$0xff]   ;;  %v2352_v16 = vld [vmem:[%s2671_s1] sm:$0xff] }
   0x6   :  { %1849 = vmatpush3.bf16.msra.mxu0 %v2117_v3  ;;  %v2128_v14 = vld [vmem:[%s2674_s4 + $0x30] sm:$0xff]   ;;  %v2357_v17 = vld [vmem:[%s2671_s1 + $0x8] sm:$0xff]  ;;  %v2130_v18 = vld [vmem:[%s2674_s4 + $0x38] sm:$0xff]  }
   0x7   :  { %1869 = vmatpush3.bf16.msra.mxu1 %v2118_v4  ;;  %1850 = vmatprep.subr.bf16.mxu0 %v2221_v1  ;;  %v39_v19 = vld [vmem:[%s2670_s0] sm:$0xff]  ;;  %v40_v20 = vld [vmem:[%s2670_s0 + $0x8] sm:$0xff]  ;;  %v43_v21 = vpack.c.bf16 %v2357_v17, %v2352_v16 }
   0x8   :  { %1870 = vmatprep.subr.bf16.mxu1 %v2221_v1  ;;  %v149_v22 = vpack.c.bf16 %v40_v20, %v39_v19 }
   0xa   :  { %1851 = vmatpush3.bf16.msra.mxu0 %v2119_v5 }
   0xb   :  { %1871 = vmatpush3.bf16.msra.mxu1 %v2120_v6  ;;  %1852 = vmatprep.subr.bf16.mxu0 %v2221_v1 }
   0xc   :  { %1872 = vmatprep.subr.bf16.mxu1 %v2221_v1 }
   0xe   :  { %1853 = vmatpush3.bf16.msra.mxu0 %v2121_v7 }
   0xf   :  { %1873 = vmatpush3.bf16.msra.mxu1 %v2122_v8  ;;  %1854 = vmatprep.subr.bf16.mxu0 %v2221_v1 }
  0x10   :  { %1874 = vmatprep.subr.bf16.mxu1 %v2221_v1 }
  0x12   :  { %1855 = vmatpush3.bf16.msra.mxu0 %v2123_v9 }
  0x13   :  { %1875 = vmatpush3.bf16.msra.mxu1 %v2124_v10  ;;  %1856 = vmatprep.subr.bf16.mxu0 %v2221_v1 }
  0x14   :  { %1876 = vmatprep.subr.bf16.mxu1 %v2221_v1 }
  0x16   :  { %1857 = vmatpush3.bf16.msra.mxu0 %v2125_v11 }
  0x17   :  { %1877 = vmatpush3.bf16.msra.mxu1 %v2126_v12  ;;  %1858 = vmatprep.subr.bf16.mxu0 %v2221_v1 }
  0x18   :  { %1878 = vmatprep.subr.bf16.mxu1 %v2221_v1 }
  0x1a   :  { %1859 = vmatpush3.bf16.msra.mxu0 %v2127_v13 }
  0x1b   :  { %1879 = vmatpush3.bf16.msra.mxu1 %v2128_v14  ;;  %1860 = vmatprep.subr.bf16.mxu0 %v2221_v1 }
  0x1c   :  { %1880 = vmatprep.subr.bf16.mxu1 %v2221_v1 }
  0x1e   :  { %1861 = vmatpush3.bf16.msra.mxu0 %v2129_v15 }
  0x1f   :  { %1881 = vmatpush3.bf16.msra.mxu1 %v2130_v18  ;;  %1886 = vmatprep.subr.bf16.mxu0 %v2221_v1 }
  0x20   :  { %1906 = vmatprep.subr.bf16.mxu1 %v2221_v1 }
  0x21   :  { %1863 = vmatmul.mubr.bf16.vlgmr.msra.gmra.mrb[0].mxu0 %v43_v21 }
  0x22   :  { %1883 = vmatmul.mubr.bf16.vlgmr.msra.gmra.mrb[0].mxu1 %v149_v22  ;;  %1902 = vmatprep.mubr.msk.bf16.mxu0 %vm2222_vm0, %v2221_v1 }
  0x23   :  { %15 = vsyncpa [#allocation3], 0  ;;  %1908 = vmatprep.mubr.msk.bf16.mxu1 %vm2222_vm0, %v2221_v1  ;;  %v2131_v23 = vld [vmem:[%s2675_s5] sm:$0xff]   ;;  %v2132_v24 = vld [vmem:[%s2675_s5 + $0x8] sm:$0xff]   ;;  %vm437_vm1 = vcmask 64512   ;;  %s2225_s29 = smov 104  }
  0x24   :  { %1887 = vmatpush3.bf16.msra.mxu0 %v2131_v23  ;;  %v2133_v25 = vld [vmem:[%s2675_s5 + $0x10] sm:$0xff]   ;;  %v2134_v26 = vld [vmem:[%s2675_s5 + $0x18] sm:$0xff]   ;;  %v2135_v27 = vld [vmem:[%s2675_s5 + $0x20] sm:$0xff]   ;;  %vm913_vm2 = vcmask 1043456   ;;  %s2226_s30 = smov 8   ;;  %s2227_s4 = smov 16  }
  0x25   :  { %1888 = vmatprep.subr.bf16.mxu0 %v2221_v1  ;;  %v2136_v28 = vld [vmem:[%s2675_s5 + $0x28] sm:$0xff]   ;;  %v2137_v29 = vld [vmem:[%s2675_s5 + $0x30] sm:$0xff]   ;;  %v2138_v30 = vld [vmem:[%s2675_s5 + $0x38] sm:$0xff]   ;;  %s2223_s5 = smov 120   ;;  %vm1305_vm3 = vcmask 130048   ;;  %vm1308_vm4 = vcmask 195584  }
  0x26   :  { %v41_v31 = vld [vmem:[%s2672_s2] sm:$0xff]  ;;  %v42_v32 = vld [vmem:[%s2672_s2 + $0x8] sm:$0xff]  ;;  %s2224_s2 = smov 112   ;;  %vm1328_vm5 = vcmask 261120  }
  0x27   :  { %v255_v33 = vpack.c.bf16 %v42_v32, %v41_v31 }
  0x28   :  { %1889 = vmatpush3.bf16.msra.mxu0 %v2132_v24 }
  0x29   :  { %1890 = vmatprep.subr.bf16.mxu0 %v2221_v1 }
  0x2c   :  { %1891 = vmatpush3.bf16.msra.mxu0 %v2133_v25 }
  0x2d   :  { %1892 = vmatprep.subr.bf16.mxu0 %v2221_v1 }
  0x30   :  { %1893 = vmatpush3.bf16.msra.mxu0 %v2134_v26 }
  0x31   :  { %1894 = vmatprep.subr.bf16.mxu0 %v2221_v1 }
  0x34   :  { %1895 = vmatpush3.bf16.msra.mxu0 %v2135_v27 }
  0x35   :  { %1896 = vmatprep.subr.bf16.mxu0 %v2221_v1 }
  0x38   :  { %1897 = vmatpush3.bf16.msra.mxu0 %v2136_v28 }
  0x39   :  { %1898 = vmatprep.subr.bf16.mxu0 %v2221_v1 }
  0x3c   :  { %1899 = vmatpush3.bf16.msra.mxu0 %v2137_v29 }
  0x3d   :  { %1900 = vmatprep.subr.bf16.mxu0 %v2221_v1 }
  0x40   :  { %1901 = vmatpush3.bf16.msra.mxu0 %v2138_v30 }
  0x41   :  { %1930 = vmatprep.subr.bf16.mxu0 %v2221_v1 }
  0x43   :  { %1903 = vmatmul.mubr.bf16.vlgmr.msra.gmra.mrb[4].mxu0 %v255_v33 }
  0x44   :  { %1932 = vmatprep.mubr.msk.bf16.mxu0 %vm2222_vm0, %v2221_v1 }
  0xf4   :  { %v142_v34 = vpop.f32.mrb[0].mxu0 }
  0xf5   :  { %v248_v35 = vpop.f32.mrb[0].mxu1  ;;  %v1864_v36 = vpop.f32.mrb[1].mxu0  ;;  %v421_v48 = vpack.c.bf16 %v142_v34, %v142_v34 }
  0xf6   :  { %383 = vrot.lane.b32.xlu0 %v248_v35, %s2223_s5  ;;  %v1884_v37 = vpop.f32.mrb[1].mxu1  ;;  %v145_v38 = vpop.f32.mrb[2].mxu0  ;;  %v429_v39 = vpack.c.bf16 %v248_v35, %v248_v35 }
  0xf7   :  { %v251_v40 = vpop.f32.mrb[2].mxu1  ;;  %365 = vrot.lane.b32.xlu1 %v145_v38, %s2223_s5  ;;  %v1865_v41 = vpop.f32.mrb[3].mxu0  ;;  %v2070_v42 = vpack.i.bf16 %v145_v38, %v142_v34  ;;  %v422_v50 = vpack.c.bf16 %v145_v38, %v145_v38 }
  0xf8   :  { %v1885_v43 = vpop.f32.mrb[3].mxu1  ;;  %v442_v44 = vsel %vm437_vm1, %v429_v39, 0  ;;  %v2060_v45 = vpack.i.bf16 %v251_v40, %v142_v34  ;;  %v2065_v46 = vpack.i.bf16 %v251_v40, %v248_v35  ;;  %v430_v47 = vpack.c.bf16 %v251_v40, %v251_v40 }
  0xf9   :  { %1907 = vmatpush3.bf16.xpose.msra.mxu1 %v442_v44 }
  0xfa   :  { %2061 = vrot.lane.b32.xlu0 %v2060_v45, %s2223_s5  ;;  %1912 = vmatprep.subr.bf16.mxu1 %v2221_v1  ;;  %v488_v49 = vsel %vm437_vm1, %v430_v47, 0 }
  0xfb   :  { %2066 = vrot.lane.b32.xlu1 %v2065_v46, %s2224_s2 }
  0xfe   :  { %2071 = vrot.lane.b32.xlu0 %v2070_v42, %s2224_s2 }
  0xff   :  { %2076 = vrot.lane.b32.xlu1 %v2065_v46, %s2225_s29 }
 0x100   :  { %1909 = vmatmul.mubr.msk.bf16.vlgmr.msra.gmra.mrb[4].mxu1 %vm437_vm1, %v421_v48 }
 0x101   :  { %1913 = vmatpush3.bf16.xpose.msra.mxu1 %v488_v49  ;;  %1914 = vmatprep.mubr.msk.bf16.mxu1 %vm2222_vm0, %v2221_v1 }
 0x102   :  { %2081 = vrot.lane.b32.xlu0 %v2070_v42, %s2225_s29  ;;  %1918 = vmatprep.subr.bf16.mxu1 %v2221_v1 }
 0x108   :  { %1915 = vmatmul.mubr.msk.bf16.vlgmr.msra.gmra.mrb[8].mxu1 %vm437_vm1, %v422_v50 }
 0x109   :  { %1920 = vmatprep.mubr.msk.bf16.mxu1 %vm2222_vm0, %v2221_v1 }
 0x116   :  { %v354_v25 = vpop.f32.mrb[4].mxu0 }
 0x117   :  { %v1904_v26 = vpop.f32.mrb[5].mxu0  ;;  %v902_v39 = vpack.c.bf16 %v354_v25, %v354_v25 }
 0x118   :  { %v357_v27 = vpop.f32.mrb[6].mxu0 }
 0x119   :  { %v1905_v28 = vpop.f32.mrb[7].mxu0  ;;  %v903_v40 = vpack.c.bf16 %v357_v27, %v357_v27  ;;  %v2467_v41 = vpack.i.bf16 %v357_v27, %v354_v25  ;;  %v915_v42 = vsel %vm913_vm2, %v902_v39, 0 }
 0x11b   :  { %v961_v43 = vsel %vm913_vm2, %v903_v40, 0 }
 0x168   :  { %v384_v51 = vpop.permute.xlu0 %383 }
 0x169   :  { %v431_v52 = vpack.c.bf16 %v384_v51, %v384_v51  ;;  %v366_v53 = vpop.permute.xlu1 %365 }
 0x16a   :  { %v424_v10 = vpack.c.bf16 %v366_v53, %v366_v53 }
 0x16b   :  { %v534_v54 = vsel %vm437_vm1, %v431_v52, 0 }
 0x16c   :  { %v2062_v55 = vpop.permute.xlu0 %2061  ;;  %1919 = vmatpush3.bf16.xpose.msra.mxu1 %v534_v54 }
 0x16d   :  { %v2064_v56 = vunpack.i.h.bf16 %v2062_v55  ;;  %v2063_v57 = vunpack.i.l.bf16 %v2062_v55  ;;  %v2067_v58 = vpop.permute.xlu1 %2066  ;;  %1924 = vmatprep.subr.bf16.mxu1 %v2221_v1 }
 0x16e   :  { %v2068_v59 = vunpack.i.l.bf16 %v2067_v58  ;;  %v2069_v4 = vunpack.i.h.bf16 %v2067_v58 }
 0x16f   :  { %v432_v60 = vpack.c.bf16 %v2064_v56, %v2064_v56  ;;  %v423_v62 = vpack.c.bf16 %v2063_v57, %v2063_v57 }
 0x170   :  { %v433_v61 = vpack.c.bf16 %v2068_v59, %v2068_v59  ;;  %v2072_v63 = vpop.permute.xlu0 %2071  ;;  %v434_v8 = vpack.c.bf16 %v2069_v4, %v2069_v4 }
 0x171   :  { %v2077_v0 = vpop.permute.xlu1 %2076  ;;  %v580_v5 = vsel %vm437_vm1, %v432_v60, 0  ;;  %v2073_v6 = vunpack.i.l.bf16 %v2072_v63  ;;  %v2074_v18 = vunpack.i.h.bf16 %v2072_v63 }
 0x172   :  { %v2078_v2 = vunpack.i.l.bf16 %v2077_v0  ;;  %v626_v3 = vsel %vm437_vm1, %v433_v61, 0  ;;  %v2079_v13 = vunpack.i.h.bf16 %v2077_v0  ;;  %v672_v14 = vsel %vm437_vm1, %v434_v8, 0 }
 0x173   :  { %1921 = vmatmul.mubr.msk.bf16.vlgmr.msra.gmra.mrb[12].mxu1 %vm437_vm1, %v423_v62  ;;  %1931 = vmatpush3.bf16.xpose.msra.mxu0 %v626_v3  ;;  %v425_v9 = vpack.c.bf16 %v2073_v6, %v2073_v6  ;;  %v426_v21 = vpack.c.bf16 %v2074_v18, %v2074_v18 }
 0x174   :  { %1925 = vmatpush3.bf16.xpose.msra.mxu1 %v580_v5  ;;  %1926 = vmatprep.mubr.msk.bf16.mxu1 %vm2222_vm0, %v2221_v1  ;;  %v435_v7 = vpack.c.bf16 %v2078_v2, %v2078_v2  ;;  %v2082_v11 = vpop.permute.xlu0 %2081  ;;  %v436_v19 = vpack.c.bf16 %v2079_v13, %v2079_v13 }
 0x175   :  { %1936 = vmatprep.subr.bf16.mxu1 %v2221_v1  ;;  %1942 = vmatprep.subr.bf16.mxu0 %v2221_v1  ;;  %v2083_v15 = vunpack.i.l.bf16 %v2082_v11  ;;  %v2084_v23 = vunpack.i.h.bf16 %v2082_v11 }
 0x176   :  { %v718_v12 = vsel %vm437_vm1, %v435_v7, 0  ;;  %v764_v22 = vsel %vm437_vm1, %v436_v19, 0 }
 0x177   :  { %v427_v20 = vpack.c.bf16 %v2083_v15, %v2083_v15  ;;  %v428_v24 = vpack.c.bf16 %v2084_v23, %v2084_v23 }
 0x17a   :  { %1933 = vmatmul.mubr.msk.bf16.vlgmr.msra.gmra.mrb[8].mxu0 %vm437_vm1, %v425_v9 }
 0x17b   :  { %1927 = vmatmul.mubr.msk.bf16.vlgmr.msra.gmra.mrb[16].mxu1 %vm437_vm1, %v424_v10  ;;  %1943 = vmatpush3.bf16.xpose.msra.mxu0 %v718_v12 }
 0x17c   :  { %1937 = vmatpush3.bf16.xpose.msra.mxu1 %v672_v14  ;;  %1938 = vmatprep.mubr.msk.bf16.mxu1 %vm2222_vm0, %v2221_v1 }
 0x17d   :  { %1944 = vmatprep.mubr.msk.bf16.mxu0 %vm2222_vm0, %v2221_v1  ;;  %1948 = vmatprep.subr.bf16.mxu1 %v2221_v1 }
 0x17e   :  { %1954 = vmatprep.subr.bf16.mxu0 %v2221_v1 }
 0x182   :  { %1945 = vmatmul.mubr.msk.bf16.vlgmr.msra.gmra.mrb[12].mxu0 %vm437_vm1, %v427_v20 }
 0x183   :  { %1939 = vmatmul.mubr.msk.bf16.vlgmr.msra.gmra.mrb[20].mxu1 %vm437_vm1, %v426_v21  ;;  %1956 = vmatprep.mubr.msk.bf16.mxu0 %vm2222_vm0, %v2221_v1 }
 0x184   :  { %1949 = vmatpush3.bf16.xpose.msra.mxu1 %v764_v22  ;;  %1950 = vmatprep.mubr.msk.bf16.mxu1 %vm2222_vm0, %v2221_v1 }
 0x185   :  { %1960 = vmatprep.subr.bf16.mxu1 %v2221_v1  ;;  %1955 = vmatpush3.bf16.msra.mxu0 %v915_v42 }
 0x186   :  { %1966 = vmatprep.subr.bf16.mxu0 %v2221_v1 }
 0x18b   :  { %1951 = vmatmul.mubr.msk.bf16.vlgmr.msra.gmra.mrb[24].mxu1 %vm437_vm1, %v428_v24 }
 0x18c   :  { %1962 = vmatprep.mubr.msk.bf16.mxu1 %vm2222_vm0, %v2221_v1  ;;  %1961 = vmatpush3.bf16.msra.mxu1 %v961_v43 }
 0x18d   :  { %1972 = vmatprep.subr.bf16.mxu1 %v2221_v1 }
 0x1d3   :  { %v478_v29 = vpop.f32.mrb[4].mxu1 }
 0x1d4   :  { %v1910_v30 = vpop.f32.mrb[5].mxu1  ;;  %v806_v31 = vsel %vm437_vm1, %v478_v29, -inf }
 0x1d5   :  { %v481_v32 = vpop.f32.mrb[6].mxu1  ;;  %807 = vmax.xlane.f32.xlu1 %v806_v31 }
 0x1d6   :  { %v1911_v33 = vpop.f32.mrb[7].mxu1 }
 0x1db   :  { %v524_v34 = vpop.f32.mrb[8].mxu1 }
 0x1dc   :  { %v1916_v35 = vpop.f32.mrb[9].mxu1  ;;  %v809_v36 = vsel %vm437_vm1, %v524_v34, -inf }
 0x1dd   :  { %810 = vmax.xlane.f32.xlu0 %v809_v36  ;;  %v527_v37 = vpop.f32.mrb[10].mxu1 }
 0x1de   :  { %v1917_v38 = vpop.f32.mrb[11].mxu1 }
 0x246   :  { %v570_v44 = vpop.f32.mrb[12].mxu1 }
 0x247   :  { %v1922_v45 = vpop.f32.mrb[13].mxu1  ;;  %v812_v46 = vsel %vm437_vm1, %v570_v44, -inf }
 0x248   :  { %813 = vmax.xlane.f32.xlu0 %v812_v46  ;;  %v573_v47 = vpop.f32.mrb[14].mxu1 }
 0x249   :  { %v1923_v48 = vpop.f32.mrb[15].mxu1 }
 0x24d   :  { %v662_v49 = vpop.f32.mrb[8].mxu0 }
 0x24e   :  { %v616_v50 = vpop.f32.mrb[16].mxu1  ;;  %v1934_v51 = vpop.f32.mrb[9].mxu0  ;;  %v818_v52 = vsel %vm437_vm1, %v662_v49, -inf }
 0x24f   :  { %v1928_v53 = vpop.f32.mrb[17].mxu1  ;;  %v815_v54 = vsel %vm437_vm1, %v616_v50, -inf  ;;  %819 = vmax.xlane.f32.xlu0 %v818_v52  ;;  %v665_v55 = vpop.f32.mrb[10].mxu0 }
 0x250   :  { %816 = vmax.xlane.f32.xlu1 %v815_v54  ;;  %v619_v56 = vpop.f32.mrb[18].mxu1  ;;  %v1935_v57 = vpop.f32.mrb[11].mxu0 }
 0x251   :  { %v1929_v58 = vpop.f32.mrb[19].mxu1 }
 0x255   :  { %v754_v59 = vpop.f32.mrb[12].mxu0 }
 0x256   :  { %v2476_v60 = vpop.f32.mrb[20].mxu1  ;;  %v1946_v61 = vpop.f32.mrb[13].mxu0  ;;  %v824_v62 = vsel %vm437_vm1, %v754_v59, -inf }
 0x257   :  { %v1940_v63 = vpop.f32.mrb[21].mxu1  ;;  %v821_v0 = vsel %vm437_vm1, %v2476_v60, -inf  ;;  %825 = vmax.xlane.f32.xlu0 %v824_v62  ;;  %v757_v2 = vpop.f32.mrb[14].mxu0 }
 0x258   :  { %822 = vmax.xlane.f32.xlu1 %v821_v0  ;;  %v711_v3 = vpop.f32.mrb[22].mxu1  ;;  %v1947_v4 = vpop.f32.mrb[15].mxu0 }
 0x259   :  { %v1941_v5 = vpop.f32.mrb[23].mxu1 }
 0x25e   :  { %v2481_v6 = vpop.f32.mrb[24].mxu1 }
 0x25f   :  { %v1952_v7 = vpop.f32.mrb[25].mxu1  ;;  %v827_v8 = vsel %vm437_vm1, %v2481_v6, -inf }
 0x260   :  { %828 = vmax.xlane.f32.xlu1 %v827_v8  ;;  %v803_v9 = vpop.f32.mrb[26].mxu1 }
 0x261   :  { %v1953_v10 = vpop.f32.mrb[27].mxu1 }
 0x262   :  { %v808_v11 = vpop.xlane.xlu1 %807 }
 0x263   :  { %v830_v12 = vsub.f32 %v478_v29, %v808_v11 }
 0x265   :  { %v838_v13 = vmul.f32 1.442695, %v830_v12 }
 0x267   :  { %2157 = vpow2.f32 %v838_v13 }
 0x26a   :  { %v811_v14 = vpop.xlane.xlu0 %810 }
 0x26b   :  { %v831_v15 = vsub.f32 %v524_v34, %v811_v14 }
 0x26d   :  { %v840_v18 = vmul.f32 1.442695, %v831_v15 }
 0x26f   :  { %2159 = vpow2.f32 %v840_v18 }
 0x271   :  { %v2158_v19 = vpop.eup %2157 }
 0x272   :  { %v854_v20 = vsel %vm437_vm1, %v2158_v19, 0.0 }
 0x273   :  { %855 = vadd.xlane.f32.xlu0 %v854_v20 }
 0x279   :  { %v2160_v21 = vpop.eup %2159 }
 0x27a   :  { %v857_v22 = vsel %vm437_vm1, %v2160_v21, 0.0 }
 0x27b   :  { %858 = vadd.xlane.f32.xlu1 %v857_v22 }
 0x2d5   :  { %v814_v23 = vpop.xlane.xlu0 %813 }
 0x2d6   :  { %v832_v24 = vsub.f32 %v570_v44, %v814_v23 }
 0x2d8   :  { %v842_v25 = vmul.f32 1.442695, %v832_v24 }
 0x2da   :  { %2161 = vpow2.f32 %v842_v25 }
 0x2dc   :  { %v820_v26 = vpop.xlane.xlu0 %819 }
 0x2dd   :  { %v817_v27 = vpop.xlane.xlu1 %816  ;;  %v834_v28 = vsub.f32 %v662_v49, %v820_v26 }
 0x2de   :  { %v833_v29 = vsub.f32 %v616_v50, %v817_v27 }
 0x2df   :  { %v846_v30 = vmul.f32 1.442695, %v834_v28 }
 0x2e0   :  { %v844_v31 = vmul.f32 1.442695, %v833_v29 }
 0x2e1   :  { %2163 = vpow2.f32 %v846_v30 }
 0x2e2   :  { %2165 = vpow2.f32 %v844_v31 }
 0x2e4   :  { %v2162_v32 = vpop.eup %2161  ;;  %v826_v33 = vpop.xlane.xlu0 %825 }
 0x2e5   :  { %v836_v34 = vsub.f32 %v754_v59, %v826_v33  ;;  %v860_v35 = vsel %vm437_vm1, %v2162_v32, 0.0  ;;  %v823_v44 = vpop.xlane.xlu1 %822 }
 0x2e6   :  { %861 = vadd.xlane.f32.xlu0 %v860_v35  ;;  %v835_v50 = vsub.f32 %v2476_v60, %v823_v44 }
 0x2e7   :  { %v850_v36 = vmul.f32 1.442695, %v836_v34 }
 0x2e8   :  { %v848_v52 = vmul.f32 1.442695, %v835_v50 }
 0x2e9   :  { %2167 = vpow2.f32 %v850_v36 }
 0x2eb   :  { %v2488_v37 = vpop.eup %2163 }
 0x2ec   :  { %v2166_v38 = vpop.eup %2165  ;;  %v866_v39 = vsel %vm437_vm1, %v2488_v37, 0.0 }
 0x2ed   :  { %v863_v40 = vsel %vm437_vm1, %v2166_v38, 0.0  ;;  %867 = vadd.xlane.f32.xlu0 %v866_v39  ;;  %v829_v46 = vpop.xlane.xlu1 %828 }
 0x2ee   :  { %864 = vadd.xlane.f32.xlu1 %v863_v40  ;;  %v837_v53 = vsub.f32 %v2481_v6, %v829_v46 }
 0x2f0   :  { %v852_v56 = vmul.f32 1.442695, %v837_v53 }
 0x2f3   :  { %v2493_v42 = vpop.eup %2167 }
 0x2f4   :  { %v872_v43 = vsel %vm437_vm1, %v2493_v42, 0.0 }
 0x2f5   :  { %873 = vadd.xlane.f32.xlu0 %v872_v43 }
 0x2ff   :  { %2091 = vrot.lane.b32.xlu1 %v2467_v41, %s2224_s2  ;;  %s2229_s2 = smov [#allocation2]  }
 0x300   :  { %v856_v45 = vpop.xlane.xlu0 %855 }
 0x301   :  { %2169 = vrcp.f32 %v856_v45 }
 0x308   :  { %v859_v47 = vpop.xlane.xlu1 %858 }
 0x309   :  { %2171 = vrcp.f32 %v859_v47 }
 0x30a   :  { %2173 = vpow2.f32 %v848_v52 }
 0x30b   :  { %v2170_v48 = vpop.eup %2169  ;;  %2086 = vrot.lane.b32.xlu0 %v2467_v41, %s2223_s5  ;;  %2175 = vpow2.f32 %v852_v56 }
 0x30c   :  { %v886_v49 = vmul.f32 %v2170_v48, %v2158_v19 }
 0x30e   :  { %v894_v51 = vpack.c.bf16 %v886_v49, %v886_v49 }
 0x310   :  { %1957 = vmatmul.mubr.msk.bf16.vlgmr.msra.gmra.mrb[16].mxu0 %vm437_vm1, %v894_v51 }
 0x311   :  { %1968 = vmatprep.mubr.msk.bf16.mxu0 %vm2222_vm0, %v2221_v1 }
 0x313   :  { %v2172_v54 = vpop.eup %2171 }
 0x314   :  { %v887_v55 = vmul.f32 %v2172_v54, %v2160_v21  ;;  %v2509_v58 = vpop.eup %2173 }
 0x315   :  { %v869_v59 = vsel %vm437_vm1, %v2509_v58, 0.0  ;;  %v2513_v60 = vpop.eup %2175 }
 0x316   :  { %v895_v57 = vpack.c.bf16 %v887_v55, %v887_v55  ;;  %v875_v61 = vsel %vm437_vm1, %v2513_v60, 0.0 }
 0x318   :  { %1963 = vmatmul.mubr.msk.bf16.vlgmr.msra.gmra.mrb[28].mxu1 %vm437_vm1, %v895_v57 }
 0x319   :  { %1974 = vmatprep.mubr.msk.bf16.mxu1 %vm2222_vm0, %v2221_v1 }
 0x323   :  { %870 = vadd.xlane.f32.xlu1 %v869_v59 }
 0x327   :  { %876 = vadd.xlane.f32.xlu1 %v875_v61 }
 0x338   :  { %2096 = vrot.lane.b32.xlu1 %v2467_v41, %s2225_s29  ;;  %s1689_s29 = sshll.u32 %s2229_s2, 4  ;;  %s1690_s29 = int_to_ptr.vmem [resolvable:$true] %s1689_s29 }
 0x339   :  { %s2197_s11 = scalar_lea.vmem %s1690_s29, 256  ;;  %p2202_p1 = scmp.lt.s32.totalorder %s1690_s29, %s1690_s29 }
 0x33a   :  { %p2198_p0 = scmp.ne.s32.totalorder %s1690_s29, %s2197_s11  ;;  %p2203_p2 = scmp.lt.s32.totalorder %s2197_s11, %s2197_s11 }
 0x33c   :  { %p2204_p3 = por %p2203_p2, %p2202_p1 }
 0x33e   :  { %p2205_p4 = pnand %p2204_p3, %p2198_p0 }
 0x373   :  { %v862_v62 = vpop.xlane.xlu0 %861 }
 0x374   :  { %2177 = vrcp.f32 %v862_v62 }
 0x37a   :  { %v868_v0 = vpop.xlane.xlu0 %867 }
 0x37b   :  { %v865_v63 = vpop.xlane.xlu1 %864 }
 0x37c   :  { %2179 = vrcp.f32 %v865_v63 }
 0x37d   :  { %2181 = vrcp.f32 %v868_v0 }
 0x37e   :  { %v2178_v4 = vpop.eup %2177 }
 0x37f   :  { %v2092_v3 = vpop.permute.xlu1 %2091  ;;  %v888_v11 = vmul.f32 %v2178_v4, %v2162_v32  ;;  %v2139_v4 = vld [vmem:[%s2676_s6] sm:$0xff]  }
 0x380   :  { %v2094_v7 = vunpack.i.h.bf16 %v2092_v3  ;;  %v2093_v8 = vunpack.i.l.bf16 %v2092_v3 }
 0x381   :  { %v896_v20 = vpack.c.bf16 %v888_v11, %v888_v11 }
 0x382   :  { %v874_v2 = vpop.xlane.xlu0 %873  ;;  %v907_v41 = vpack.c.bf16 %v2094_v7, %v2094_v7  ;;  %v906_v15 = vpack.c.bf16 %v2093_v8, %v2093_v8 }
 0x383   :  { %2183 = vrcp.f32 %v874_v2 }
 0x384   :  { %v1099_v23 = vsel %vm913_vm2, %v906_v15, 0  ;;  %v1145_v24 = vsel %vm913_vm2, %v907_v41, 0 }
 0x386   :  { %v2180_v5 = vpop.eup %2179  ;;  %v2087_v6 = vpop.permute.xlu0 %2086 }
 0x387   :  { %v2089_v9 = vunpack.i.h.bf16 %v2087_v6  ;;  %v2088_v10 = vunpack.i.l.bf16 %v2087_v6  ;;  %v889_v12 = vmul.f32 %v2180_v5, %v2166_v38  ;;  %v2182_v22 = vpop.eup %2181  ;;  %v2140_v5 = vld [vmem:[%s2676_s6 + $0x8] sm:$0xff]   ;;  %s2228_s6 = smov 24  }
 0x388   :  { %v890_v25 = vmul.f32 %v2182_v22, %v2488_v37 }
 0x389   :  { %v905_v13 = vpack.c.bf16 %v2089_v9, %v2089_v9  ;;  %v904_v14 = vpack.c.bf16 %v2088_v10, %v2088_v10  ;;  %v897_v21 = vpack.c.bf16 %v889_v12, %v889_v12 }
 0x38a   :  { %v898_v26 = vpack.c.bf16 %v890_v25, %v890_v25 }
 0x38b   :  { %v1007_v18 = vsel %vm913_vm2, %v904_v14, 0  ;;  %v1053_v19 = vsel %vm913_vm2, %v905_v13, 0 }
 0x38c   :  { %1967 = vmatpush3.bf16.msra.mxu0 %v1007_v18  ;;  %1973 = vmatpush3.bf16.msra.mxu1 %v1053_v19 }
 0x38d   :  { %1978 = vmatprep.subr.bf16.mxu0 %v2221_v1  ;;  %1984 = vmatprep.subr.bf16.mxu1 %v2221_v1  ;;  %v2184_v29 = vpop.eup %2183 }
 0x38e   :  { %v892_v34 = vmul.f32 %v2184_v29, %v2493_v42 }
 0x38f   :  { %1969 = vmatmul.mubr.msk.bf16.vlgmr.msra.gmra.mrb[20].mxu0 %vm437_vm1, %v896_v20  ;;  %1975 = vmatmul.mubr.msk.bf16.vlgmr.msra.gmra.mrb[32].mxu1 %vm437_vm1, %v897_v21 }
 0x390   :  { %1979 = vmatpush3.bf16.msra.mxu0 %v1099_v23  ;;  %1985 = vmatpush3.bf16.msra.mxu1 %v1145_v24  ;;  %v900_v43 = vpack.c.bf16 %v892_v34, %v892_v34 }
 0x391   :  { %1980 = vmatprep.mubr.msk.bf16.mxu0 %vm2222_vm0, %v2221_v1  ;;  %1990 = vmatprep.subr.bf16.mxu0 %v2221_v1 }
 0x392   :  { %1986 = vmatprep.mubr.msk.bf16.mxu1 %vm2222_vm0, %v2221_v1  ;;  %1996 = vmatprep.subr.bf16.mxu1 %v2221_v1 }
 0x397   :  { %1981 = vmatmul.mubr.msk.bf16.vlgmr.msra.gmra.mrb[24].mxu0 %vm437_vm1, %v898_v26 }
 0x398   :  { %1992 = vmatprep.mubr.msk.bf16.mxu0 %vm2222_vm0, %v2221_v1 }
 0x3b0   :  { %v871_v27 = vpop.xlane.xlu1 %870 }
 0x3b1   :  { %2185 = vrcp.f32 %v871_v27 }
 0x3b4   :  { %v877_v28 = vpop.xlane.xlu1 %876 }
 0x3b5   :  { %2187 = vrcp.f32 %v877_v28 }
 0x3b8   :  { %v2097_v30 = vpop.permute.xlu1 %2096 }
 0x3b9   :  { %v2099_v31 = vunpack.i.h.bf16 %v2097_v30  ;;  %v2098_v32 = vunpack.i.l.bf16 %v2097_v30 }
 0x3bb   :  { %v2186_v33 = vpop.eup %2185  ;;  %v908_v35 = vpack.c.bf16 %v2098_v32, %v2098_v32  ;;  %v909_v37 = vpack.c.bf16 %v2099_v31, %v2099_v31 }
 0x3bc   :  { %v891_v36 = vmul.f32 %v2186_v33, %v2509_v58 }
 0x3bd   :  { %v1191_v38 = vsel %vm913_vm2, %v908_v35, 0  ;;  %v1237_v44 = vsel %vm913_vm2, %v909_v37, 0 }
 0x3be   :  { %1991 = vmatpush3.bf16.msra.mxu0 %v1191_v38  ;;  %v899_v39 = vpack.c.bf16 %v891_v36, %v891_v36 }
 0x3bf   :  { %v2188_v40 = vpop.eup %2187  ;;  %2002 = vmatprep.subr.bf16.mxu0 %v2221_v1 }
 0x3c0   :  { %1987 = vmatmul.mubr.msk.bf16.vlgmr.msra.gmra.mrb[36].mxu1 %vm437_vm1, %v899_v39  ;;  %v893_v42 = vmul.f32 %v2188_v40, %v2513_v60 }
 0x3c1   :  { %1997 = vmatpush3.bf16.msra.mxu1 %v1237_v44  ;;  %1993 = vmatmul.mubr.msk.bf16.vlgmr.msra.gmra.mrb[28].mxu0 %vm437_vm1, %v900_v43 }
 0x3c2   :  { %1998 = vmatprep.mubr.msk.bf16.mxu1 %vm2222_vm0, %v2221_v1  ;;  %2006 = vmatprep.mubr.msk.bf16.mxu0 %vm2222_vm0, %v2221_v1  ;;  %v901_v45 = vpack.c.bf16 %v893_v42, %v893_v42  ;;  %v2141_v42 = vld [vmem:[%s2677_s7] sm:$0xff]  }
 0x3c3   :  { %2010 = vmatprep.subr.bf16.mxu1 %v2221_v1  ;;  %2003 = vmatpush3.bf16.msra.mxu0 %v2139_v4 }
 0x3c4   :  { %2004 = vmatprep.subr.bf16.mxu0 %v2221_v1 }
 0x3c7   :  { %2005 = vmatpush3.bf16.msra.mxu0 %v2140_v5 }
 0x3c8   :  { %1999 = vmatmul.mubr.msk.bf16.vlgmr.msra.gmra.mrb[40].mxu1 %vm437_vm1, %v901_v45  ;;  %2030 = vmatprep.subr.bf16.mxu0 %v2221_v1  ;;  %v2142_v45 = vld [vmem:[%s2677_s7 + $0x8] sm:$0xff]  }
 0x3c9   :  { %2026 = vmatprep.mubr.msk.bf16.mxu1 %vm2222_vm0, %v2221_v1  ;;  %2011 = vmatpush3.bf16.msra.mxu1 %v2141_v42 }
 0x3ca   :  { %2012 = vmatprep.subr.bf16.mxu1 %v2221_v1 }
 0x3cd   :  { %2013 = vmatpush3.bf16.msra.mxu1 %v2142_v45 }
 0x3ce   :  { %2014 = vmatprep.subr.bf16.mxu1 %v2221_v1 }
 0x3e3   :  { %v951_v46 = vpop.f32.mrb[16].mxu0 }
 0x3e4   :  { %v1958_v47 = vpop.f32.mrb[17].mxu0 }
 0x3e5   :  { %v954_v48 = vpop.f32.mrb[18].mxu0  ;;  %v2579_v47 = vld [vmem:[%s2679_s9 + $0x6] ss:$0 sm:$0xff] }
 0x3e6   :  { %v1959_v49 = vpop.f32.mrb[19].mxu0 }
 0x3eb   :  { %v997_v50 = vpop.f32.mrb[28].mxu1 }
 0x3ec   :  { %v1964_v51 = vpop.f32.mrb[29].mxu1 }
 0x3ed   :  { %v1000_v52 = vpop.f32.mrb[30].mxu1 }
 0x3ee   :  { %v1965_v53 = vpop.f32.mrb[31].mxu1 }
 0x462   :  { %v1043_v54 = vpop.f32.mrb[20].mxu0  ;;  %v1089_v55 = vpop.f32.mrb[32].mxu1 }
 0x463   :  { %v2100_v56 = vpack.i.bf16 %v1089_v55, %v1043_v54  ;;  %v1970_v57 = vpop.f32.mrb[21].mxu0  ;;  %v1976_v58 = vpop.f32.mrb[33].mxu1  ;;  %v2143_v55 = vld [vmem:[%s2677_s7 + $0x10] sm:$0xff]  }
 0x464   :  { %v1046_v59 = vpop.f32.mrb[22].mxu0  ;;  %v1092_v60 = vpop.f32.mrb[34].mxu1  ;;  %2015 = vmatpush3.bf16.msra.mxu1 %v2143_v55  ;;  %v2145_v57 = vld [vmem:[%s2677_s7 + $0x20] sm:$0xff]   ;;  %v2146_v58 = vld [vmem:[%s2677_s7 + $0x28] sm:$0xff]  }
 0x465   :  { %v1977_v61 = vpop.f32.mrb[35].mxu1  ;;  %2101 = vrot.lane.b32.xlu0 %v2100_v56, %s2226_s30  ;;  %v1971_v62 = vpop.f32.mrb[23].mxu0  ;;  %2016 = vmatprep.subr.bf16.mxu1 %v2221_v1  ;;  %v2144_v56 = vld [vmem:[%s2677_s7 + $0x18] sm:$0xff]   ;;  %v2147_v59 = vld [vmem:[%s2677_s7 + $0x30] sm:$0xff]  }
 0x466   :  { %v2148_v60 = vld [vmem:[%s2677_s7 + $0x38] sm:$0xff]   ;;  %v2149_v61 = vld [vmem:[%s2678_s8] sm:$0xff]   ;;  %v2150_v62 = vld [vmem:[%s2678_s8 + $0x8] sm:$0xff]  }
 0x468   :  { %2017 = vmatpush3.bf16.msra.mxu1 %v2144_v56 }
 0x469   :  { %2018 = vmatprep.subr.bf16.mxu1 %v2221_v1 }
 0x46a   :  { %v1135_v63 = vpop.f32.mrb[24].mxu0 }
 0x46b   :  { %v1982_v0 = vpop.f32.mrb[25].mxu0 }
 0x46c   :  { %v1138_v2 = vpop.f32.mrb[26].mxu0  ;;  %2019 = vmatpush3.bf16.msra.mxu1 %v2145_v57  ;;  %v2152_v0 = vld [vmem:[%s2678_s8 + $0x18] sm:$0xff]  }
 0x46d   :  { %v1983_v3 = vpop.f32.mrb[27].mxu0  ;;  %2020 = vmatprep.subr.bf16.mxu1 %v2221_v1  ;;  %v2153_v2 = vld [vmem:[%s2678_s8 + $0x20] sm:$0xff]  }
 0x46e   :  { %v2154_v3 = vld [vmem:[%s2678_s8 + $0x28] sm:$0xff]  }
 0x470   :  { %2021 = vmatpush3.bf16.msra.mxu1 %v2146_v58 }
 0x471   :  { %2022 = vmatprep.subr.bf16.mxu1 %v2221_v1 }
 0x474   :  { %2023 = vmatpush3.bf16.msra.mxu1 %v2147_v59  ;;  %v1764_v59 = vld [vmem:[%s2679_s9 + $0x2] ss:$0 sm:$0xff] }
 0x475   :  { %2024 = vmatprep.subr.bf16.mxu1 %v2221_v1 }
 0x478   :  { %2025 = vmatpush3.bf16.msra.mxu1 %v2148_v60 }
 0x493   :  { %v1181_v6 = vpop.f32.mrb[36].mxu1 }
 0x494   :  { %v2105_v7 = vpack.i.bf16 %v1181_v6, %v1135_v63  ;;  %v1988_v8 = vpop.f32.mrb[37].mxu1  ;;  %v1227_v9 = vpop.f32.mrb[28].mxu0  ;;  %v2151_v63 = vld [vmem:[%s2678_s8 + $0x10] sm:$0xff]  }
 0x495   :  { %v1184_v10 = vpop.f32.mrb[38].mxu1  ;;  %v1994_v11 = vpop.f32.mrb[29].mxu0 }
 0x496   :  { %v1989_v12 = vpop.f32.mrb[39].mxu1  ;;  %2106 = vrot.lane.b32.xlu1 %v2105_v7, %s2227_s4  ;;  %v1230_v13 = vpop.f32.mrb[30].mxu0  ;;  %v1744_v11 = vld [vmem:[%s2679_s9] ss:$0 sm:$0xff] }
 0x497   :  { %v1995_v14 = vpop.f32.mrb[31].mxu0 }
 0x49b   :  { %v1273_v41 = vpop.f32.mrb[40].mxu1 }
 0x49c   :  { %v2110_v15 = vpack.i.bf16 %v1273_v41, %v1227_v9  ;;  %v2000_v18 = vpop.f32.mrb[41].mxu1 }
 0x49d   :  { %v1276_v19 = vpop.f32.mrb[42].mxu1 }
 0x49e   :  { %v2001_v20 = vpop.f32.mrb[43].mxu1  ;;  %2111 = vrot.lane.b32.xlu0 %v2110_v15, %s2228_s6  ;;  %v1745_v15 = vld [vmem:[%s2679_s9 + $0x1] ss:$0 sm:$0xff] }
 0x4d7   :  { %v2102_v21 = vpop.permute.xlu0 %2101 }
 0x4d8   :  { %v2104_v23 = vunpack.i.h.bf16 %v2102_v21  ;;  %v2103_v24 = vunpack.i.l.bf16 %v2102_v21 }
 0x4da   :  { %v1304_v28 = vsel %vm437_vm1, %v997_v50, %v2104_v23  ;;  %v1303_v29 = vsel %vm437_vm1, %v951_v46, %v2103_v24  ;;  %v2156_v23 = vld [vmem:[%s2678_s8 + $0x38] sm:$0xff]   ;;  %v1746_v24 = vld [vmem:[%s2679_s9 + $0x5] ss:$0 sm:$0xff] }
 0x508   :  { %v2107_v22 = vpop.permute.xlu1 %2106 }
 0x509   :  { %v2109_v25 = vunpack.i.h.bf16 %v2107_v22  ;;  %v2108_v26 = vunpack.i.l.bf16 %v2107_v22  ;;  %v2155_v22 = vld [vmem:[%s2678_s8 + $0x30] sm:$0xff]  }
 0x50b   :  { %v1307_v32 = vsel %vm1305_vm3, %v1304_v28, %v2109_v25  ;;  %v1306_v33 = vsel %vm1305_vm3, %v1303_v29, %v2108_v26 }
 0x510   :  { %v2112_v27 = vpop.permute.xlu0 %2111 }
 0x511   :  { %v2114_v30 = vunpack.i.h.bf16 %v2112_v27  ;;  %v2113_v31 = vunpack.i.l.bf16 %v2112_v27 }
 0x513   :  { %v1310_v34 = vsel %vm1308_vm4, %v1307_v32, %v2114_v30  ;;  %v1309_v35 = vsel %vm1308_vm4, %v1306_v33, %v2113_v31 }
 0x514   :  { %v1311_v36 = vpack.c.bf16 %v1310_v34, %v1309_v35 }
 0x516   :  { %2007 = vmatmul.mubr.msk.bf16.vlgmr.msra.gmra.mrb[32].mxu0 %vm1328_vm5, %v1311_v36 }
 0x517   :  { %2046 = vmatprep.mubr.msk.bf16.mxu0 %vm2222_vm0, %v2221_v1  ;;  %2031 = vmatpush3.bf16.msra.mxu0 %v2149_v61 }
 0x518   :  { %2032 = vmatprep.subr.bf16.mxu0 %v2221_v1 }
 0x51b   :  { %2033 = vmatpush3.bf16.msra.mxu0 %v2150_v62 }
 0x51c   :  { %2034 = vmatprep.subr.bf16.mxu0 %v2221_v1 }
 0x51f   :  { %2035 = vmatpush3.bf16.msra.mxu0 %v2151_v63 }
 0x520   :  { %2036 = vmatprep.subr.bf16.mxu0 %v2221_v1 }
 0x523   :  { %2037 = vmatpush3.bf16.msra.mxu0 %v2152_v0 }
 0x524   :  { %2038 = vmatprep.subr.bf16.mxu0 %v2221_v1 }
 0x527   :  { %2039 = vmatpush3.bf16.msra.mxu0 %v2153_v2 }
 0x528   :  { %2040 = vmatprep.subr.bf16.mxu0 %v2221_v1 }
 0x52b   :  { %2041 = vmatpush3.bf16.msra.mxu0 %v2154_v3 }
 0x52c   :  { %2042 = vmatprep.subr.bf16.mxu0 %v2221_v1 }
 0x52f   :  { %2043 = vmatpush3.bf16.msra.mxu0 %v2155_v22 }
 0x530   :  { %2044 = vmatprep.subr.bf16.mxu0 %v2221_v1  ;;  %v1755_v1 = vld [vmem:[%s2679_s9 + $0x4] ss:$0 sm:$0xff] }
 0x533   :  { %2045 = vmatpush3.bf16.msra.mxu0 %v2156_v23 }
 0x5e9   :  { %v1366_v37 = vpop.f32.mrb[32].mxu0 }
 0x5ea   :  { %v1380_v38 = vadd.f32 %v1366_v37, %v2352_v16  ;;  %v2008_v39 = vpop.f32.mrb[33].mxu0 }
 0x5eb   :  { %v1369_v40 = vpop.f32.mrb[34].mxu0 }
 0x5ec   :  { %v1381_v43 = vadd.f32 %v1369_v40, %v2357_v17  ;;  %1382 = vadd.xlane.f32.xlu1 %v1380_v38  ;;  %v2009_v44 = vpop.f32.mrb[35].mxu0 }
 0x5ee   :  { %1384 = vadd.xlane.f32.xlu0 %v1381_v43 }
 0x679   :  { %v1383_v16 = vpop.xlane.xlu1 %1382 }
 0x67a   :  { %v1386_v46 = vmul.f32 0.03125, %v1383_v16 }
 0x67b   :  { %v1385_v17 = vpop.xlane.xlu0 %1384 }
 0x67c   :  { %v1388_v48 = vsub.f32 %v1380_v38, %v1386_v46  ;;  %v1387_v49 = vmul.f32 0.03125, %v1385_v17 }
 0x67e   :  { %v1389_v50 = vsub.f32 %v1381_v43, %v1387_v49  ;;  %v1394_v51 = vmul.f32 %v2579_v47, %v1388_v48 }
 0x680   :  { %v1396_v52 = vmul.f32 %v1394_v51, %v1394_v51  ;;  %v1395_v53 = vmul.f32 %v2579_v47, %v1389_v50 }
 0x682   :  { %1398 = vadd.xlane.f32.xlu0 %v1396_v52  ;;  %v1397_v54 = vmul.f32 %v1395_v53, %v1395_v53 }
 0x684   :  { %1400 = vadd.xlane.f32.xlu1 %v1397_v54 }
 0x70f   :  { %v1399_v4 = vpop.xlane.xlu0 %1398 }
 0x710   :  { %v1402_v5 = vmul.f32 0.03125, %v1399_v4 }
 0x711   :  { %v1401_v6 = vpop.xlane.xlu1 %1400 }
 0x712   :  { %v1404_v7 = vadd.f32 1e-05, %v1402_v5  ;;  %v1403_v8 = vmul.f32 0.03125, %v1401_v6 }
 0x714   :  { %2189 = vrsqrt.f32 %v1404_v7  ;;  %v1405_v9 = vadd.f32 1e-05, %v1403_v8 }
 0x716   :  { %2191 = vrsqrt.f32 %v1405_v9 }
 0x71e   :  { %v2190_v10 = vpop.eup %2189 }
 0x71f   :  { %v1408_v12 = vmul.f32 %v2190_v10, %v1394_v51 }
 0x720   :  { %v2192_v13 = vpop.eup %2191 }
 0x721   :  { %v1409_v14 = vmul.f32 %v2192_v13, %v1395_v53  ;;  %v1414_v41 = vmul.f32 %v1744_v11, %v1408_v12 }
 0x723   :  { %v1415_v18 = vmul.f32 %v1744_v11, %v1409_v14  ;;  %v1420_v19 = vadd.f32 %v1745_v15, %v1414_v41 }
 0x725   :  { %v1421_v20 = vadd.f32 %v1745_v15, %v1415_v18 }
 0x727   :  { %v1422_v21 = vpack.c.bf16 %v1421_v20, %v1420_v19 }
 0x729   :  { %2027 = vmatmul.mubr.bf16.vlgmr.msra.gmra.mrb[44].mxu1 %v1422_v21 }
 0x7fc   :  { %v1525_v25 = vpop.f32.mrb[44].mxu1 }
 0x7fd   :  { %v1526_v26 = vadd.f32 %v1746_v24, %v1525_v25  ;;  %v2028_v27 = vpop.f32.mrb[45].mxu1 }
 0x7fe   :  { %v1528_v28 = vpop.f32.mrb[46].mxu1 }
 0x7ff   :  { %v1529_v29 = vadd.f32 %v1746_v24, %v1528_v28  ;;  %v2029_v30 = vpop.f32.mrb[47].mxu1  ;;  %v1532_v31 = vmax.f32 %v1526_v26, 0.0 }
 0x801   :  { %v1533_v32 = vmax.f32 %v1529_v29, 0.0 }
 0x803   :  { %v1534_v33 = vpack.c.bf16 %v1533_v32, %v1532_v31 }
 0x805   :  { %2047 = vmatmul.mubr.bf16.vlgmr.msra.gmra.mrb[36].mxu0 %v1534_v33 }
 0x8d8   :  { %v1637_v34 = vpop.f32.mrb[36].mxu0 }
 0x8d9   :  { %v1638_v35 = vadd.f32 %v1755_v1, %v1637_v34  ;;  %v2048_v36 = vpop.f32.mrb[37].mxu0 }
 0x8da   :  { %v1640_v37 = vpop.f32.mrb[38].mxu0 }
 0x8db   :  { %v1641_v38 = vadd.f32 %v1755_v1, %v1640_v37  ;;  %v2049_v39 = vpop.f32.mrb[39].mxu0  ;;  %v1644_v40 = vadd.f32 %v1638_v35, %v1420_v19 }
 0x8dd   :  { %1646 = vadd.xlane.f32.xlu0 %v1644_v40  ;;  %v1645_v43 = vadd.f32 %v1641_v38, %v1421_v20 }
 0x8df   :  { %1648 = vadd.xlane.f32.xlu1 %v1645_v43 }
 0x96a   :  { %v1647_v44 = vpop.xlane.xlu0 %1646 }
 0x96b   :  { %v1650_v42 = vmul.f32 0.03125, %v1647_v44 }
 0x96c   :  { %v1649_v45 = vpop.xlane.xlu1 %1648 }
 0x96d   :  { %v1652_v16 = vsub.f32 %v1644_v40, %v1650_v42  ;;  %v1651_v46 = vmul.f32 0.03125, %v1649_v45 }
 0x96f   :  { %v1653_v17 = vsub.f32 %v1645_v43, %v1651_v46  ;;  %v1654_v48 = vmul.f32 %v2579_v47, %v1652_v16 }
 0x971   :  { %v1656_v49 = vmul.f32 %v1654_v48, %v1654_v48  ;;  %v1655_v50 = vmul.f32 %v2579_v47, %v1653_v17  ;;  %v1765_v47 = vld [vmem:[%s2679_s9 + $0x3] ss:$0 sm:$0xff] }
 0x973   :  { %1658 = vadd.xlane.f32.xlu0 %v1656_v49  ;;  %v1657_v51 = vmul.f32 %v1655_v50, %v1655_v50 }
 0x975   :  { %1660 = vadd.xlane.f32.xlu1 %v1657_v51 }
 0xa00   :  { %v1659_v52 = vpop.xlane.xlu0 %1658 }
 0xa01   :  { %v1662_v53 = vmul.f32 0.03125, %v1659_v52 }
 0xa02   :  { %v1661_v54 = vpop.xlane.xlu1 %1660 }
 0xa03   :  { %v1664_v55 = vadd.f32 1e-05, %v1662_v53  ;;  %v1663_v56 = vmul.f32 0.03125, %v1661_v54 }
 0xa05   :  { %2193 = vrsqrt.f32 %v1664_v55  ;;  %v1665_v57 = vadd.f32 1e-05, %v1663_v56 }
 0xa07   :  { %2195 = vrsqrt.f32 %v1665_v57 }
 0xa0f   :  { %v2194_v58 = vpop.eup %2193 }
 0xa10   :  { %v1668_v60 = vmul.f32 %v2194_v58, %v1654_v48 }
 0xa11   :  { %v2196_v61 = vpop.eup %2195 }
 0xa12   :  { %v1669_v62 = vmul.f32 %v2196_v61, %v1655_v50  ;;  %v1674_v63 = vmul.f32 %v1764_v59, %v1668_v60 }
 0xa14   :  { %v1675_v0 = vmul.f32 %v1764_v59, %v1669_v62  ;;  %v1680_v2 = vadd.f32 %v1765_v47, %v1674_v63 }
 0xa16   :  { %v1681_v3 = vadd.f32 %v1765_v47, %v1675_v0  ;;  %1682 = vst [vmem:[#allocation2] sm:$0xff] %v1680_v2 }
 0xa18   :  { %1683 = vst [vmem:[#allocation2 + $0x8] sm:$0xff] %v1681_v3 }
 0xa19   :  { %2208 = shalt.err (!%p2205_p4)
}
 0xa1a   :  { %s2209_s9 = scalar_lea.hbm %s2680_s10, 256 }
 0xa1b   :  { %p2210_p5 = scmp.ne.s32.totalorder %s2680_s10, %s2209_s9  ;;  %p2213_p6 = scmp.lt.u32.totalorder %s2209_s9, %s2680_s10 }
 0xa1d   :  { %p2215_p7 = pnand %p2213_p6, %p2210_p5 }
 0xa1f   :  { %2218 = shalt.err (!%p2215_p7)
}
 0xa20   :  { %s2230_s12 = smov 128  }
 0xa21   :  { %1695 = dma.vmem_to_hbm [thread:$0]  %s1690_s29, 256, %s2680_s10, [#allocation3], %s2230_s12, %s2230_s12, %s2226_s30  }
 0xa22   :  { %2219 = dma.done.wait [#allocation3], 256  }
 0xa23   :  { %2220 = vsyncadd [#allocation3], 4294967040 }
 0xa24   :  { %1699 = vsyncpa [#allocation3], 1 }

</bundles_post_ra>
